<compile_context>
chip_gen: v7x
topology: tpu7x:2x2x1
jax: 0.10.0
libtpu: 0.0.40
codegen_flags: <defaults>
</compile_context>

<pallas_src>
import functools

import jax
import jax.numpy as jnp
from jax.experimental import pallas as pl
from jax.experimental.pallas import tpu as pltpu

# ----------------------------- model dims -----------------------------------
PC = 3               # lit-image channels (x : N x 3 x H x W)
DC = 3               # direction channels (light / view)
F_ENC = 8            # Fourier frequencies per encoder -> encoder output = 2*F_ENC
HID_R = 32           # resnet hidden width
C_REP = 8            # neural feature rep channels (rx)
HID_M = 32           # render_net hidden width
C_OUT = 3            # rendered image channels (px)
N_IN = 4 * DC + PC   # packed per-pixel channels: [lt, vt, rl_lt, rl_vt, x] = 15
C_OUT_ALL = C_REP + C_OUT  # merged output rows: [rx(8); px(3)] = 11

MAX_TP = 8192        # max pixels (lanes) per grid step


def _round_up(x, m):
    return (x + m - 1) // m * m


# ------------------- packed weight / bias layout (static) --------------------
# All matmul weights live in one (W_ROWS, 32) bf16 slab; each weight starts at
# a 16-aligned sublane offset (bf16 sublane pairing) and uses columns 0:K.
_W_SPECS = [  # (name, (out_rows, in_cols))
    ("w_enc",  (2 * F_ENC, 4 * DC)),   # block-diag Fourier encoders
    ("w_r1_s", (HID_R, F_ENC)),
    ("w_r1_c", (HID_R, F_ENC)),
    ("w_r1_x", (HID_R, PC)),
    ("w_r2_h", (C_REP, HID_R)),
    ("w_r2_s", (C_REP, F_ENC)),
    ("w_r2_c", (C_REP, F_ENC)),
    ("w_m1_r", (HID_M, C_REP)),
    ("w_m1_s", (HID_M, F_ENC)),
    ("w_m1_c", (HID_M, F_ENC)),
    ("w_m2",   (HID_M, HID_M)),
    ("w_m3",   (C_OUT, HID_M)),
]
_W_SHAPE = dict(_W_SPECS)
W_COLS = 32
_W_OFF = {}
_row = 0
for _name, (_r, _c) in _W_SPECS:
    _W_OFF[_name] = _row
    _row = _round_up(_row + _r, 16)
W_ROWS = _row            # 304

# Biases live in one (B_ROWS, 1) f32 slab; every offset is 8-aligned.
_B_SPECS = [("b_r1", HID_R), ("b_r2", C_REP), ("b_m1", HID_M),
            ("b_m2", HID_M), ("b_m3", C_OUT)]
_B_SHAPE = dict(_B_SPECS)
_B_OFF = {}
_brow = 0
for _name, _r in _B_SPECS:
    _B_OFF[_name] = _brow
    _brow = _round_up(_brow + _r, 8)
B_ROWS = _brow           # 112


# ------------------------------ Pallas kernel --------------------------------
def _relit_kernel(slab_ref, w_ref, b_ref, out_ref):
    """slab_ref: (N_IN, TP) f32   w_ref: (W_ROWS, 32) bf16
       b_ref: (B_ROWS, 1) f32     out_ref: (C_OUT_ALL, TP) f32 = [rx; px]."""
    dot = functools.partial(jnp.dot, preferred_element_type=jnp.float32)
    bf = jnp.bfloat16

    def w(name):  # static-slice view of the packed bf16 weight slab
        r0, (rows, cols) = _W_OFF[name], _W_SHAPE[name]
        return w_ref[r0:r0 + rows, 0:cols]

    def b(name):  # static-slice view of the packed f32 bias slab, (rows, 1)
        r0, rows = _B_OFF[name], _B_SHAPE[name]
        return b_ref[r0:r0 + rows, :]

    slab = slab_ref[...]                          # (15, TP) channel-major tile
    dirs = slab[0:4 * DC, :].astype(bf)           # (12, TP): [lt; vt; rl_lt; rl_vt]
    xc = jnp.log1p(slab[4 * DC:, :])              # (3, TP)  HDR log compression (f32)

    # Both Fourier encoders in one block-diagonal bf16 matmul (f32 accumulate).
    f = dot(w("w_enc"), dirs)                     # (16, TP): rows 0:8 = f1, 8:16 = f2
    s = jnp.sin(f)                                # f32 (EUP)
    c = jnp.cos(f)
    s1 = s[0:F_ENC].astype(bf)
    c1 = c[0:F_ENC].astype(bf)
    s2 = s[F_ENC:].astype(bf)
    c2 = c[F_ENC:].astype(bf)

    # resnet(cat([xc, enc]), enc): split accumulating dots, no operand concat.
    # TODO(synk): folding b_r1 into a matmul is no longer free with split dots
    # (would need a ones-row operand copy), so it stays a VPU bias add.
    h = jnp.maximum(
        dot(w("w_r1_s"), s1) + dot(w("w_r1_c"), c1)
        + dot(w("w_r1_x"), xc.astype(bf)) + b("b_r1"), 0.0)
    rx = (dot(w("w_r2_h"), h.astype(bf)) + dot(w("w_r2_s"), s1)
          + dot(w("w_r2_c"), c1) + b("b_r2"))

    # render_net(rx, pr_encoded_position): split accumulating dots.
    h1 = jnp.maximum(
        dot(w("w_m1_r"), rx.astype(bf)) + dot(w("w_m1_s"), s2)
        + dot(w("w_m1_c"), c2) + b("b_m1"), 0.0)
    h2 = jnp.maximum(dot(w("w_m2"), h1.astype(bf)) + b("b_m2"), 0.0)
    px = dot(w("w_m3"), h2.astype(bf)) + b("b_m3")

    out_ref[0:C_REP, :] = rx.astype(out_ref.dtype)      # rows 0:8  (aligned)
    out_ref[C_REP:, :] = px.astype(out_ref.dtype)       # rows 8:11 (8-aligned)


# ------------------------------ parameters -----------------------------------
def init_params(key):
    def nrm(k, shape, scale=0.1):
        return scale * jax.random.normal(k, shape, dtype=jnp.float32)

    ks = jax.random.split(key, 16)
    p = {
        # input encoder (Fourier frequency matrices)
        "b1l": nrm(ks[0], (DC, F_ENC), 1.0),
        "b1v": nrm(ks[1], (DC, F_ENC), 1.0),
        # render encoder
        "b2l": nrm(ks[2], (DC, F_ENC), 1.0),
        "b2v": nrm(ks[3], (DC, F_ENC), 1.0),
        # resnet (input processor, 1x1 convs)
        "wr1x": nrm(ks[4], (PC, HID_R)),
        "wr1s": nrm(ks[5], (F_ENC, HID_R)),
        "wr1c": nrm(ks[6], (F_ENC, HID_R)),
        "br1": nrm(ks[7], (1, HID_R)),
        "wr2": nrm(ks[8], (HID_R, C_REP)),
        "br2": nrm(ks[9], (1, C_REP)),
        "wsks": nrm(ks[10], (F_ENC, C_REP)),
        "wskc": nrm(ks[11], (F_ENC, C_REP)),
        # render net (renderer MLP, 1x1 convs)
        "wm1x": nrm(ks[12], (C_REP, HID_M)),
        "wm1s": nrm(ks[13], (F_ENC, HID_M)),
        "wm1c": nrm(ks[14], (F_ENC, HID_M)),
        "bm1": nrm(ks[15], (1, HID_M)),
    }
    ks2 = jax.random.split(jax.random.fold_in(key, 1), 4)
    p.update({
        "wm2": nrm(ks2[0], (HID_M, HID_M)),
        "bm2": nrm(ks2[1], (1, HID_M)),
        "wm3": nrm(ks2[2], (HID_M, C_OUT)),
        "bm3": nrm(ks2[3], (1, C_OUT)),
    })
    return p


def _pack_params(p):
    """Transpose / fuse weights and pack them into one bf16 slab + one f32 bias slab."""
    zero = jnp.zeros((F_ENC, 2 * DC), jnp.float32)
    w_e1 = jnp.concatenate([p["b1l"].T, p["b1v"].T], axis=1)     # (8, 6)
    w_e2 = jnp.concatenate([p["b2l"].T, p["b2v"].T], axis=1)     # (8, 6)
    w_enc = jnp.concatenate(                                     # block-diag (16, 12)
        [jnp.concatenate([w_e1, zero], axis=1),
         jnp.concatenate([zero, w_e2], axis=1)], axis=0)

    mats = {
        "w_enc": w_enc,
        "w_r1_s": p["wr1s"].T, "w_r1_c": p["wr1c"].T, "w_r1_x": p["wr1x"].T,
        "w_r2_h": p["wr2"].T, "w_r2_s": p["wsks"].T, "w_r2_c": p["wskc"].T,
        "w_m1_r": p["wm1x"].T, "w_m1_s": p["wm1s"].T, "w_m1_c": p["wm1c"].T,
        "w_m2": p["wm2"].T, "w_m3": p["wm3"].T,
    }
    wpack = jnp.zeros((W_ROWS, W_COLS), jnp.float32)
    for name, (r, c) in _W_SPECS:
        off = _W_OFF[name]
        wpack = wpack.at[off:off + r, 0:c].set(mats[name])
    wpack = wpack.astype(jnp.bfloat16)                           # bf16 MXU path

    bias = {"b_r1": p["br1"].T, "b_r2": p["br2"].T, "b_m1": p["bm1"].T,
            "b_m2": p["bm2"].T, "b_m3": p["bm3"].T}
    bpack = jnp.zeros((B_ROWS, 1), jnp.float32)
    for name, r in _B_SPECS:
        off = _B_OFF[name]
        bpack = bpack.at[off:off + r, :].set(bias[name])
    return wpack, bpack


# ------------------------------- tiling ---------------------------------------
def _tiling(hw, n):
    """Pick a lane tile (multiple of 128, <= MAX_TP) and padded row length."""
    hw128 = _round_up(hw, 128)
    tp = min(MAX_TP, hw128)
    # v7x has 2 TensorCores: make sure the (n, hw_pad//tp) grid has >= 2 steps
    # whenever the problem allows it.
    if n * (-(-hw128 // tp)) < 2 and hw128 >= 256:
        tp = _round_up(hw128 // 2, 128)
    # shrink the tile until zero-padding overhead is <= ~12.5%, but never below
    # 512 lanes (per-step pipeline overhead dominates tiny tiles).
    while tp > 512 and (-hw) % tp > hw // 8:
        tp -= 128
    hw_pad = _round_up(hw, tp)
    return tp, hw_pad


# ------------------------------- wrapper --------------------------------------
def relit_pixel_net(x, lt, vt, rl_lt, rl_vt, params):
    """Forward pass. All tensors are NCHW float32 (PyTorch convention)."""
    N, _, H, W = x.shape
    HW = H * W

    def cm(a):  # NCHW -> (N, C, H*W), a free reshape (no transpose)
        return a.reshape(N, a.shape[1], HW)

    # One packed channel-major input slab: [lt, vt, rl_lt, rl_vt, x] -> (N,15,HW)
    slab = jnp.concatenate([cm(lt), cm(vt), cm(rl_lt), cm(rl_vt), cm(x)], axis=1)

    tp, hw_pad = _tiling(HW, N)
    if hw_pad != HW:
        slab = jnp.pad(slab, ((0, 0), (0, 0), (0, hw_pad - HW)))

    wpack, bpack = _pack_params(params)

    grid = (N, hw_pad // tp)
    in_specs = [
        pl.BlockSpec((None, N_IN, tp), lambda n, t: (n, 0, t)),      # data
        pl.BlockSpec((W_ROWS, W_COLS), lambda n, t: (0, 0)),         # weights (bf16)
        pl.BlockSpec((B_ROWS, 1), lambda n, t: (0, 0)),              # biases  (f32)
    ]
    out_specs = pl.BlockSpec((None, C_OUT_ALL, tp), lambda n, t: (n, 0, t))
    out_shape = jax.ShapeDtypeStruct((N, C_OUT_ALL, hw_pad), jnp.float32)

    out_cm = pl.pallas_call(
        _relit_kernel,
        out_shape=out_shape,
        grid=grid,
        in_specs=in_specs,
        out_specs=out_specs,
        compiler_params=pltpu.CompilerParams(
            dimension_semantics=("parallel", "parallel"),
            vmem_limit_bytes=32 * 1024 * 1024),
    )(slab, wpack, bpack)

    rx = out_cm[:, :C_REP, :HW].reshape(N, C_REP, H, W)
    px = out_cm[:, C_REP:, :HW].reshape(N, C_OUT, H, W)
    return px, rx


# --------------------------- pure-JAX reference --------------------------------
def relit_pixel_net_ref(x, lt, vt, rl_lt, rl_vt, p):
    N, _, H, W = x.shape
    P = N * H * W

    def flat(a):
        return jnp.transpose(a, (0, 2, 3, 1)).reshape(P, a.shape[1])

    xf, ltf, vtf, rllf, rlvf = map(flat, (x, lt, vt, rl_lt, rl_vt))
    xc = jnp.log1p(xf)
    f1 = ltf @ p["b1l"] + vtf @ p["b1v"]
    s1, c1 = jnp.sin(f1), jnp.cos(f1)
    h = jnp.maximum(xc @ p["wr1x"] + s1 @ p["wr1s"] + c1 @ p["wr1c"] + p["br1"], 0.0)
    rx = h @ p["wr2"] + p["br2"] + s1 @ p["wsks"] + c1 @ p["wskc"]
    f2 = rllf @ p["b2l"] + rlvf @ p["b2v"]
    s2, c2 = jnp.sin(f2), jnp.cos(f2)
    h1 = jnp.maximum(rx @ p["wm1x"] + s2 @ p["wm1s"] + c2 @ p["wm1c"] + p["bm1"], 0.0)
    h2 = jnp.maximum(h1 @ p["wm2"] + p["bm2"], 0.0)
    px = h2 @ p["wm3"] + p["bm3"]
    px = px.reshape(N, H, W, C_OUT).transpose(0, 3, 1, 2)
    rx = rx.reshape(N, H, W, C_REP).transpose(0, 3, 1, 2)
    return px, rx


# --------------------------------- main ----------------------------------------
if __name__ == "__main__":
    key = jax.random.PRNGKey(0)
    kx, kl, kv, krl, krv, kp = jax.random.split(key, 6)

    N, H, W = 2, 16, 16

    def unit_dirs(k):
        d = jax.random.normal(k, (N, DC, H, W), dtype=jnp.float32)
        return d / jnp.linalg.norm(d, axis=1, keepdims=True)

    x = jnp.abs(jax.random.normal(kx, (N, PC, H, W), dtype=jnp.float32))  # linear HDR
    lt, vt = unit_dirs(kl), unit_dirs(kv)
    rl_lt, rl_vt = unit_dirs(krl), unit_dirs(krv)

    params = init_params(kp)

    fwd = jax.jit(relit_pixel_net)
    px, rx = fwd(x, lt, vt, rl_lt, rl_vt, params)
    jax.block_until_ready((px, rx))

    px_ref, rx_ref = relit_pixel_net_ref(x, lt, vt, rl_lt, rl_vt, params)
    assert px.shape == (N, C_OUT, H, W) and rx.shape == (N, C_REP, H, W)
    # bf16 MXU path -> relaxed tolerance (accumulation and nonlinearities stay f32)
    assert jnp.allclose(px, px_ref, atol=2e-2, rtol=2e-2)
    assert jnp.allclose(rx, rx_ref, atol=2e-2, rtol=2e-2)

    print("KERNEL_OK")
</pallas_src>

<mosaic_0001>
module attributes {stable_mosaic.version = 11 : i64} {
  func.func @_relit_kernel(%arg0: i32, %arg1: i32, %arg2: memref<1x15x256xf32, #tpu.memory_space<vmem>>, %arg3: memref<304x32xbf16, #tpu.memory_space<vmem>>, %arg4: memref<112x1xf32, #tpu.memory_space<vmem>>, %arg5: memref<1x11x256xf32, #tpu.memory_space<vmem>>) attributes {dimension_semantics = [#tpu.dimension_semantics<parallel>, #tpu.dimension_semantics<parallel>], iteration_bounds = array<i64: 2, 1>, scalar_prefetch = 0 : i64, scratch_operands = 0 : i64, tpu.core_type = #tpu.core_type<tc>, window_params = [{transform_indices = @transform_0, window_bounds = array<i64: 1, 15, 256>}, {pipeline_mode = #tpu.pipeline_mode<synchronous>, transform_indices = @transform_1, window_bounds = array<i64: 304, 32>}, {pipeline_mode = #tpu.pipeline_mode<synchronous>, transform_indices = @transform_2, window_bounds = array<i64: 112, 1>}, {transform_indices = @transform_3, window_bounds = array<i64: 1, 11, 256>}]} {
    %c0 = arith.constant 0 : index
    %c0_0 = arith.constant 0 : index
    %c0_1 = arith.constant 0 : index
    %0 = vector.load %arg2[%c0, %c0_0, %c0_1] : memref<1x15x256xf32, #tpu.memory_space<vmem>>, vector<1x15x256xf32>
    %1 = vector.shape_cast %0 : vector<1x15x256xf32> to vector<15x256xf32>
    %2 = vector.extract_strided_slice %1 {offsets = [0, 0], sizes = [12, 256], strides = [1, 1]} : vector<15x256xf32> to vector<12x256xf32>
    %3 = arith.truncf %2 : vector<12x256xf32> to vector<12x256xbf16>
    %4 = vector.extract_strided_slice %1 {offsets = [12, 0], sizes = [3, 256], strides = [1, 1]} : vector<15x256xf32> to vector<3x256xf32>
    %5 = math.log1p %4 : vector<3x256xf32>
    %c0_2 = arith.constant 0 : index
    %c0_3 = arith.constant 0 : index
    %6 = vector.load %arg3[%c0_2, %c0_3] : memref<304x32xbf16, #tpu.memory_space<vmem>>, vector<16x12xbf16>
    %cst = arith.constant dense<0.000000e+00> : vector<16x256xf32>
    %7 = tpu.matmul %6, %3, %cst {dimension_numbers = #tpu.dot_dimension_numbers<[1], [0], [0], [1], [0, 0, 1, 1], [], []>} : vector<16x12xbf16>, vector<12x256xbf16>, vector<16x256xf32> -> vector<16x256xf32>
    %8 = math.sin %7 : vector<16x256xf32>
    %9 = math.cos %7 : vector<16x256xf32>
    %10 = vector.extract_strided_slice %8 {offsets = [0, 0], sizes = [8, 256], strides = [1, 1]} : vector<16x256xf32> to vector<8x256xf32>
    %11 = arith.truncf %10 : vector<8x256xf32> to vector<8x256xbf16>
    %12 = vector.extract_strided_slice %9 {offsets = [0, 0], sizes = [8, 256], strides = [1, 1]} : vector<16x256xf32> to vector<8x256xf32>
    %13 = arith.truncf %12 : vector<8x256xf32> to vector<8x256xbf16>
    %14 = vector.extract_strided_slice %8 {offsets = [8, 0], sizes = [8, 256], strides = [1, 1]} : vector<16x256xf32> to vector<8x256xf32>
    %15 = arith.truncf %14 : vector<8x256xf32> to vector<8x256xbf16>
    %16 = vector.extract_strided_slice %9 {offsets = [8, 0], sizes = [8, 256], strides = [1, 1]} : vector<16x256xf32> to vector<8x256xf32>
    %17 = arith.truncf %16 : vector<8x256xf32> to vector<8x256xbf16>
    %c16 = arith.constant 16 : index
    %c0_4 = arith.constant 0 : index
    %18 = vector.load %arg3[%c16, %c0_4] : memref<304x32xbf16, #tpu.memory_space<vmem>>, vector<32x8xbf16>
    %cst_5 = arith.constant dense<0.000000e+00> : vector<32x256xf32>
    %19 = tpu.matmul %18, %11, %cst_5 {dimension_numbers = #tpu.dot_dimension_numbers<[1], [0], [0], [1], [0, 0, 1, 1], [], []>} : vector<32x8xbf16>, vector<8x256xbf16>, vector<32x256xf32> -> vector<32x256xf32>
    %c48 = arith.constant 48 : index
    %c0_6 = arith.constant 0 : index
    %20 = vector.load %arg3[%c48, %c0_6] : memref<304x32xbf16, #tpu.memory_space<vmem>>, vector<32x8xbf16>
    %cst_7 = arith.constant dense<0.000000e+00> : vector<32x256xf32>
    %21 = tpu.matmul %20, %13, %cst_7 {dimension_numbers = #tpu.dot_dimension_numbers<[1], [0], [0], [1], [0, 0, 1, 1], [], []>} : vector<32x8xbf16>, vector<8x256xbf16>, vector<32x256xf32> -> vector<32x256xf32>
    %22 = arith.addf %19, %21 : vector<32x256xf32>
    %c80 = arith.constant 80 : index
    %c0_8 = arith.constant 0 : index
    %23 = vector.load %arg3[%c80, %c0_8] : memref<304x32xbf16, #tpu.memory_space<vmem>>, vector<32x3xbf16>
    %24 = arith.truncf %5 : vector<3x256xf32> to vector<3x256xbf16>
    %cst_9 = arith.constant dense<0.000000e+00> : vector<32x256xf32>
    %25 = tpu.matmul %23, %24, %cst_9 {dimension_numbers = #tpu.dot_dimension_numbers<[1], [0], [0], [1], [0, 0, 1, 1], [], []>} : vector<32x3xbf16>, vector<3x256xbf16>, vector<32x256xf32> -> vector<32x256xf32>
    %26 = arith.addf %22, %25 : vector<32x256xf32>
    %c0_10 = arith.constant 0 : index
    %c0_11 = arith.constant 0 : index
    %27 = vector.load %arg4[%c0_10, %c0_11] : memref<112x1xf32, #tpu.memory_space<vmem>>, vector<32x1xf32>
    %28 = vector.broadcast %27 : vector<32x1xf32> to vector<32x256xf32>
    %29 = arith.addf %26, %28 : vector<32x256xf32>
    %cst_12 = arith.constant 0.000000e+00 : f32
    %30 = vector.broadcast %cst_12 : f32 to vector<32x256xf32>
    %31 = arith.maximumf %29, %30 : vector<32x256xf32>
    %c112 = arith.constant 112 : index
    %c0_13 = arith.constant 0 : index
    %32 = vector.load %arg3[%c112, %c0_13] : memref<304x32xbf16, #tpu.memory_space<vmem>>, vector<8x32xbf16>
    %33 = arith.truncf %31 : vector<32x256xf32> to vector<32x256xbf16>
    %cst_14 = arith.constant dense<0.000000e+00> : vector<8x256xf32>
    %34 = tpu.matmul %32, %33, %cst_14 {dimension_numbers = #tpu.dot_dimension_numbers<[1], [0], [0], [1], [0, 0, 1, 1], [], []>} : vector<8x32xbf16>, vector<32x256xbf16>, vector<8x256xf32> -> vector<8x256xf32>
    %c128 = arith.constant 128 : index
    %c0_15 = arith.constant 0 : index
    %35 = vector.load %arg3[%c128, %c0_15] : memref<304x32xbf16, #tpu.memory_space<vmem>>, vector<8x8xbf16>
    %cst_16 = arith.constant dense<0.000000e+00> : vector<8x256xf32>
    %36 = tpu.matmul %35, %11, %cst_16 {dimension_numbers = #tpu.dot_dimension_numbers<[1], [0], [0], [1], [0, 0, 1, 1], [], []>} : vector<8x8xbf16>, vector<8x256xbf16>, vector<8x256xf32> -> vector<8x256xf32>
    %37 = arith.addf %34, %36 : vector<8x256xf32>
    %c144 = arith.constant 144 : index
    %c0_17 = arith.constant 0 : index
    %38 = vector.load %arg3[%c144, %c0_17] : memref<304x32xbf16, #tpu.memory_space<vmem>>, vector<8x8xbf16>
    %cst_18 = arith.constant dense<0.000000e+00> : vector<8x256xf32>
    %39 = tpu.matmul %38, %13, %cst_18 {dimension_numbers = #tpu.dot_dimension_numbers<[1], [0], [0], [1], [0, 0, 1, 1], [], []>} : vector<8x8xbf16>, vector<8x256xbf16>, vector<8x256xf32> -> vector<8x256xf32>
    %40 = arith.addf %37, %39 : vector<8x256xf32>
    %c32 = arith.constant 32 : index
    %c0_19 = arith.constant 0 : index
    %41 = vector.load %arg4[%c32, %c0_19] : memref<112x1xf32, #tpu.memory_space<vmem>>, vector<8x1xf32>
    %42 = vector.broadcast %41 : vector<8x1xf32> to vector<8x256xf32>
    %43 = arith.addf %40, %42 : vector<8x256xf32>
    %c160 = arith.constant 160 : index
    %c0_20 = arith.constant 0 : index
    %44 = vector.load %arg3[%c160, %c0_20] : memref<304x32xbf16, #tpu.memory_space<vmem>>, vector<32x8xbf16>
    %45 = arith.truncf %43 : vector<8x256xf32> to vector<8x256xbf16>
    %cst_21 = arith.constant dense<0.000000e+00> : vector<32x256xf32>
    %46 = tpu.matmul %44, %45, %cst_21 {dimension_numbers = #tpu.dot_dimension_numbers<[1], [0], [0], [1], [0, 0, 1, 1], [], []>} : vector<32x8xbf16>, vector<8x256xbf16>, vector<32x256xf32> -> vector<32x256xf32>
    %c192 = arith.constant 192 : index
    %c0_22 = arith.constant 0 : index
    %47 = vector.load %arg3[%c192, %c0_22] : memref<304x32xbf16, #tpu.memory_space<vmem>>, vector<32x8xbf16>
    %cst_23 = arith.constant dense<0.000000e+00> : vector<32x256xf32>
    %48 = tpu.matmul %47, %15, %cst_23 {dimension_numbers = #tpu.dot_dimension_numbers<[1], [0], [0], [1], [0, 0, 1, 1], [], []>} : vector<32x8xbf16>, vector<8x256xbf16>, vector<32x256xf32> -> vector<32x256xf32>
    %49 = arith.addf %46, %48 : vector<32x256xf32>
    %c224 = arith.constant 224 : index
    %c0_24 = arith.constant 0 : index
    %50 = vector.load %arg3[%c224, %c0_24] : memref<304x32xbf16, #tpu.memory_space<vmem>>, vector<32x8xbf16>
    %cst_25 = arith.constant dense<0.000000e+00> : vector<32x256xf32>
    %51 = tpu.matmul %50, %17, %cst_25 {dimension_numbers = #tpu.dot_dimension_numbers<[1], [0], [0], [1], [0, 0, 1, 1], [], []>} : vector<32x8xbf16>, vector<8x256xbf16>, vector<32x256xf32> -> vector<32x256xf32>
    %52 = arith.addf %49, %51 : vector<32x256xf32>
    %c40 = arith.constant 40 : index
    %c0_26 = arith.constant 0 : index
    %53 = vector.load %arg4[%c40, %c0_26] : memref<112x1xf32, #tpu.memory_space<vmem>>, vector<32x1xf32>
    %54 = vector.broadcast %53 : vector<32x1xf32> to vector<32x256xf32>
    %55 = arith.addf %52, %54 : vector<32x256xf32>
    %cst_27 = arith.constant 0.000000e+00 : f32
    %56 = vector.broadcast %cst_27 : f32 to vector<32x256xf32>
    %57 = arith.maximumf %55, %56 : vector<32x256xf32>
    %c256 = arith.constant 256 : index
    %c0_28 = arith.constant 0 : index
    %58 = vector.load %arg3[%c256, %c0_28] : memref<304x32xbf16, #tpu.memory_space<vmem>>, vector<32x32xbf16>
    %59 = arith.truncf %57 : vector<32x256xf32> to vector<32x256xbf16>
    %cst_29 = arith.constant dense<0.000000e+00> : vector<32x256xf32>
    %60 = tpu.matmul %58, %59, %cst_29 {dimension_numbers = #tpu.dot_dimension_numbers<[1], [0], [0], [1], [0, 0, 1, 1], [], []>} : vector<32x32xbf16>, vector<32x256xbf16>, vector<32x256xf32> -> vector<32x256xf32>
    %c72 = arith.constant 72 : index
    %c0_30 = arith.constant 0 : index
    %61 = vector.load %arg4[%c72, %c0_30] : memref<112x1xf32, #tpu.memory_space<vmem>>, vector<32x1xf32>
    %62 = vector.broadcast %61 : vector<32x1xf32> to vector<32x256xf32>
    %63 = arith.addf %60, %62 : vector<32x256xf32>
    %cst_31 = arith.constant 0.000000e+00 : f32
    %64 = vector.broadcast %cst_31 : f32 to vector<32x256xf32>
    %65 = arith.maximumf %63, %64 : vector<32x256xf32>
    %c288 = arith.constant 288 : index
    %c0_32 = arith.constant 0 : index
    %66 = vector.load %arg3[%c288, %c0_32] : memref<304x32xbf16, #tpu.memory_space<vmem>>, vector<3x32xbf16>
    %67 = arith.truncf %65 : vector<32x256xf32> to vector<32x256xbf16>
    %cst_33 = arith.constant dense<0.000000e+00> : vector<3x256xf32>
    %68 = tpu.matmul %66, %67, %cst_33 {dimension_numbers = #tpu.dot_dimension_numbers<[1], [0], [0], [1], [0, 0, 1, 1], [], []>} : vector<3x32xbf16>, vector<32x256xbf16>, vector<3x256xf32> -> vector<3x256xf32>
    %c104 = arith.constant 104 : index
    %c0_34 = arith.constant 0 : index
    %69 = vector.load %arg4[%c104, %c0_34] : memref<112x1xf32, #tpu.memory_space<vmem>>, vector<3x1xf32>
    %70 = vector.broadcast %69 : vector<3x1xf32> to vector<3x256xf32>
    %71 = arith.addf %68, %70 : vector<3x256xf32>
    %c0_35 = arith.constant 0 : index
    %c0_36 = arith.constant 0 : index
    %c0_37 = arith.constant 0 : index
    %72 = vector.load %arg5[%c0_35, %c0_36, %c0_37] : memref<1x11x256xf32, #tpu.memory_space<vmem>>, vector<1x8x256xf32>
    %73 = vector.shape_cast %72 : vector<1x8x256xf32> to vector<8x256xf32>
    %74 = vector.shape_cast %43 : vector<8x256xf32> to vector<1x8x256xf32>
    tpu.vector_store %arg5[%c0_35, %c0_36, %c0_37], %74 {strides = array<i32>} : memref<1x11x256xf32, #tpu.memory_space<vmem>>, vector<1x8x256xf32>,
    %c0_38 = arith.constant 0 : index
    %c8 = arith.constant 8 : index
    %c0_39 = arith.constant 0 : index
    %75 = vector.load %arg5[%c0_38, %c8, %c0_39] : memref<1x11x256xf32, #tpu.memory_space<vmem>>, vector<1x3x256xf32>
    %76 = vector.shape_cast %75 : vector<1x3x256xf32> to vector<3x256xf32>
    %77 = vector.shape_cast %71 : vector<3x256xf32> to vector<1x3x256xf32>
    tpu.vector_store %arg5[%c0_38, %c8, %c0_39], %77 {strides = array<i32>} : memref<1x11x256xf32, #tpu.memory_space<vmem>>, vector<1x3x256xf32>,
    return
  }
  func.func @transform_0(%arg0: i32, %arg1: i32) -> (i32, i32, i32) {
    %c0_i32 = arith.constant 0 : i32
    %c0_i32_0 = arith.constant 0 : i32
    return %arg0, %c0_i32, %arg1 : i32, i32, i32
  }
  func.func @transform_1(%arg0: i32, %arg1: i32) -> (i32, i32) {
    %c0_i32 = arith.constant 0 : i32
    %c0_i32_0 = arith.constant 0 : i32
    %c0_i32_1 = arith.constant 0 : i32
    return %c0_i32, %c0_i32_0 : i32, i32
  }
  func.func @transform_2(%arg0: i32, %arg1: i32) -> (i32, i32) {
    %c0_i32 = arith.constant 0 : i32
    %c0_i32_0 = arith.constant 0 : i32
    %c0_i32_1 = arith.constant 0 : i32
    return %c0_i32, %c0_i32_0 : i32, i32
  }
  func.func @transform_3(%arg0: i32, %arg1: i32) -> (i32, i32, i32) {
    %c0_i32 = arith.constant 0 : i32
    %c0_i32_0 = arith.constant 0 : i32
    return %arg0, %c0_i32, %arg1 : i32, i32, i32
  }
}

</mosaic_0001>

<bundles_post_ra>
// kernel: relit_pixel_net.1
= control target key start
LH: loop header
LB: loop body
LE: loop exit
PB: predicated region body
PF: predicated region fallthrough
CT: control target
= control target key end

     0   :  { %s2378_s12 = smov 0   ;;  %s2380_s13 = smov 0   ;;  %s3042_s0 = inlined_call_operand.vmem [shape: f32[2,15,256], index: 0, kind: input, shape index: {}]   ;;  %s3043_s1 = inlined_call_operand.vmem [shape: bf16[304,32], index: 1, kind: input, shape index: {}]   ;;  %s3044_s2 = inlined_call_operand.vmem [shape: f32[112,1], index: 2, kind: input, shape index: {}]   ;;  %s3045_s3 = inlined_call_operand.vmem [shape: f32[2,11,256], index: 3, kind: output, shape index: {}]  }
   0x1   :  { %s2382_s14 = smov 0  }
   0x2 LB: > { %s25_s15 = sadd.s32 1, %s2344_s13  ;;  %p2126_p0 = scmp.ge.s32.totalorder %s2348_s14, 1  ;;  %s2348_s14 = sphi %s2382_s14, %s13_s14   ;;  %s2344_s13 = sphi %s2380_s13, %s3072_s13   ;;  %s2340_s12 = sphi %s2378_s12, %s3071_s12  }
   0x3   : > { %p27_p1 = scmp.ge.s32.totalorder %s25_s15, 2  ;;  %p158_p2 = scmp.lt.s32.totalorder %s2348_s14, 3 }
   0x5   : > { %s3074_s15 = smov (%p27_p1, %s25_s15), 0  ;;  %p159_p3 = pnand %p2126_p0, %p158_p2 }
   0x6   : > { %p191_p4 = scmp.lt.s32.totalorder (!%p159_p3), %s2340_s12, 1  ;;  %v2350_v0 = vmov (!%p159_p3), 0   ;;  %vm246_vm0 = vcmask (!%p159_p3), 1045504   ;;  %v2291_v7 = vld [vmem:[%s3043_s1] sm:$0xff] (!%p159_p3)   ;;  %vm242_vm1 = vcmask (!%p159_p3), 97280   ;;  %v1392_v60 = vld [vmem:[%s3044_s2 + $0x10] sm:$0xff] (!%p159_p3) }
   0x7   : > { %162 = sbr.rel (%p159_p3) target bundleno = 1536 (0x600), region = 32  ;;  %285 = vmatprep.mubr.bf16.mxu0 (!%p159_p3), %v2350_v0  ;;  %1196 = vmatprep.mubr.bf16.mxu1 (!%p159_p3), %v2350_v0  ;;  %v2351_v48 = vmov (!%p159_p3), 683565275   ;;  %v2352_v50 = vmov (!%p159_p3), 2475754826   ;;  %v1390_v59 = vld [vmem:[%s3044_s2] sm:$0xff] (!%p159_p3) }
   0x8   : > { %2289 = vset.pattern.permute.xlu0 (!%p159_p3), %v2350_v0  ;;  %2290 = vset.pattern.permute.xlu1 (!%p159_p3), %v2350_v0  ;;  %v2353_v53 = vmov (!%p159_p3), 2131351028   ;;  %v2354_v55 = vmov (!%p159_p3), 2102212464   ;;  %v2355_v57 = vmov (!%p159_p3), 920167782  }
   0x9   : > { %1396 = vperm.xlu0 (!%p159_p3), %2289, %v1390_v59   ;;  %1406 = vperm.xlu1 (!%p159_p3), %2290, %v1392_v60  }
   0xe   : > { %s3076_s12 = smov (!%p191_p4, %s2340_s12), 1 }
   0xf   : > { %s2207_s16 = sshll.u32 %s3076_s12, 5 }
  0x10   : > { %s198_s19 = scalar_lea.vmem %s3042_s0, %s2207_s16  ;;  %s2986_s30 = scalar_lea.vmem %s3045_s3, %s2207_s16 }
  0x11   : > { %v212_v1 = vld [vmem:[%s198_s19 + $0x8] sm:$0xff]  ;;  %v2408_v2 = vld [vmem:[%s198_s19 + $0x18] sm:$0x7f]  ;;  %v211_v3 = vld [vmem:[%s198_s19] sm:$0xff] }
  0x12   : > { %v216_v4 = vpack.c.bf16 %v2408_v2, %v212_v1  ;;  %v2411_v5 = vld [vmem:[%s198_s19 + $0x10] sm:$0x7f]  ;;  %v2432_v19 = vadd.f32 1.0, %v2408_v2 }
  0x13   : > { %v215_v6 = vpack.c.bf16 %v2411_v5, %v211_v3  ;;  %v217_v10 = vadd.f32 1.0, %v2411_v5  ;;  %v2438_v23 = vmul.f32 -0.5, %v2411_v5 }
  0x14   : > { %2132 = vmatprep.subr.msk.bf16.mxu0 %vm246_vm0, %v216_v4 }
  0x15   : > { %v248_v8 = vsel %vm246_vm0, %v215_v6, 0  ;;  %2306 = vlog2.f32 %v217_v10  ;;  %v2356_v6 = vmov 1326507024  }
  0x16   : > { %254 = vmatpush1.bf16.msra.mxu0 %v248_v8  ;;  %v1391_v8 = vld [vmem:[%s3044_s2 + $0x8] sm:$0xff]  ;;  %2308 = vlog2.f32 %v2432_v19  ;;  %v1878_v19 = vld [vmem:[%s3044_s2 + $0x60] sm:$0xff] }
  0x17   : > { %1401 = vperm.xlu0 %2289, %v1391_v8  }
  0x19   : > { %2133 = vmatmul.mubr.msk.bf16.vlgmr.msra.gmra.mrb[0].mxu0 %vm242_vm1, %v2291_v7 }
  0x1a   : > { %1471 = vmatprep.mubr.bf16.mxu0 %v2350_v0 }
  0x1f   : > { %v2476_v61 = vpop.eup %2306 }
  0xec   : > { %v2418_v9 = vpop.f32.mrb[0].mxu0 }
  0xed   : > { %v296_v11 = vand.u32 2147483647, %v2418_v9  ;;  %v299_v12 = vand.u32 2139095040, %v2418_v9  ;;  %v2423_v13 = vpop.f32.mrb[1].mxu0 }
  0xee   : > { %v400_v14 = vand.u32 2147483647, %v2423_v13  ;;  %v403_v15 = vand.u32 2139095040, %v2423_v13  ;;  %v2427_v16 = vpop.f32.mrb[2].mxu0 }
  0xef   : > { %v300_v17 = vshrl.u32 %v299_v12, 23  ;;  %v303_v18 = vand.u32 8388607, %v296_v11  ;;  %v507_v22 = vand.u32 2139095040, %v2427_v16  ;;  %v504_v25 = vand.u32 2147483647, %v2427_v16 }
  0xf0   : > { %v404_v20 = vshrl.u32 %v403_v15, 23  ;;  %v407_v21 = vand.u32 8388607, %v400_v14  ;;  %v2441_v26 = vpop.f32.mrb[3].mxu0 }
  0xf1   : > { %v2134_v24 = vadd.s32 4294967169, %v300_v17  ;;  %v304_v27 = vor.u32 8388608, %v303_v18  ;;  %v508_v29 = vshrl.u32 %v507_v22, 23  ;;  %v2445_v34 = vand.u32 8388607, %v504_v25  ;;  %v1393_v18 = vld [vmem:[%s3044_s2 + $0x18] sm:$0xff] }
  0xf2   : > { %v2138_v28 = vadd.s32 4294967169, %v404_v20  ;;  %v408_v31 = vor.u32 8388608, %v407_v21  ;;  %v611_v35 = vand.u32 2139095040, %v2441_v26  ;;  %v608_v38 = vand.u32 2147483647, %v2441_v26  ;;  %1411 = vperm.xlu1 %2290, %v1393_v18   ;;  %v1829_v18 = vld [vmem:[%s3044_s2 + $0x38] sm:$0xff] }
  0xf3   : > { %v306_v30 = vadd.s32 1, %v2134_v24  ;;  %v2142_v33 = vadd.s32 4294967169, %v508_v29  ;;  %v2448_v37 = vshll.u32 %v304_v27, 8  ;;  %v512_v45 = vor.u32 8388608, %v2445_v34 }
  0xf4   : > { %v410_v32 = vadd.s32 1, %v2138_v28  ;;  %v2453_v42 = vshll.u32 %v408_v31, 8  ;;  %v2464_v52 = vshrl.u32 %v611_v35, 23  ;;  %v1572_v35 = vld [vmem:[%s3044_s2 + $0x20] sm:$0xff] }
  0xf5   : > { %vm307_vm2 = vcmp.gt.s32.totalorder %v306_v30, 0  ;;  %v2460_v46 = vadd.s32 1, %v2142_v33  ;;  %1575 = vperm.xlu0 %2289, %v1572_v35  }
  0xf6   : > { %v308_v36 = vsel %vm307_vm2, %v306_v30, 0  ;;  %vm411_vm3 = vcmp.gt.s32.totalorder %v410_v32, 0 }
  0xf7   : > { %v2451_v39 = vshrl.u32 %v308_v36, 5  ;;  %v310_v40 = vand.u32 31, %v308_v36  ;;  %v412_v41 = vsel %vm411_vm3, %v410_v32, 0  ;;  %vm515_vm8 = vcmp.gt.s32.totalorder %v2460_v46, 0 }
  0xf8   : > { %v2455_v43 = vshrl.u32 %v412_v41, 5  ;;  %v2457_v44 = vand.u32 31, %v412_v41  ;;  %vm402_vm3 = vcmp.lt.s32.totalorder %v2423_v13, 0 }
  0xf9   : > { %v311_v47 = vsub.s32 32, %v310_v40  ;;  %v313_v49 = vshll.u32 %v2351_v48, %v310_v40  ;;  %v316_v51 = vshll.u32 %v2352_v50, %v310_v40  ;;  %v319_v54 = vshll.u32 %v2353_v53, %v310_v40 }
  0xfa   : > { %v322_v56 = vshll.u32 %v2354_v55, %v310_v40  ;;  %v325_v58 = vshll.u32 %v2355_v57, %v310_v40  ;;  %vm328_vm4 = vcmp.lt.s32.totalorder %v2451_v39, 1  ;;  %vm329_vm5 = vcmp.lt.s32.totalorder %v2451_v39, 2 }
  0xfb   : > { %v314_v62 = vshrl.u32 %v2352_v50, %v311_v47  ;;  %v317_v63 = vshrl.u32 %v2353_v53, %v311_v47  ;;  %v320_v1 = vshrl.u32 %v2354_v55, %v311_v47  ;;  %v312_v3 = vshrl.u32 %v2351_v48, %v311_v47 }
  0xfc   : > { %v323_v4 = vshrl.u32 %v2355_v57, %v311_v47  ;;  %v326_v7 = vshrl.u32 %v2356_v6, %v311_v47  ;;  %vm330_vm6 = vcmp.lt.s32.totalorder %v2451_v39, 3  ;;  %v415_v17 = vsub.s32 32, %v2457_v44 }
  0xfd   : > { %v315_v10 = vor.u32 %v314_v62, %v313_v49  ;;  %v318_v12 = vor.u32 %v317_v63, %v316_v51  ;;  %v321_v15 = vor.u32 %v320_v1, %v319_v54  ;;  %vm331_vm7 = vcmp.lt.s32.totalorder %v2451_v39, 4  ;;  %v1827_v49 = vld [vmem:[%s3044_s2 + $0x28] sm:$0xff]  ;;  %v1828_v39 = vld [vmem:[%s3044_s2 + $0x30] sm:$0xff] }
  0xfe   : > { %v324_v20 = vor.u32 %v323_v4, %v322_v56  ;;  %v327_v21 = vor.u32 %v326_v7, %v325_v58  ;;  %v417_v22 = vshll.u32 %v2351_v48, %v2457_v44  ;;  %v420_v33 = vshll.u32 %v2352_v50, %v2457_v44  ;;  %1833 = vperm.xlu1 %2290, %v1827_v49  }
  0xff   : > { %v332_v24 = vsel %vm328_vm4, %v312_v3, %v315_v10  ;;  %v333_v27 = vsel %vm331_vm7, %v321_v15, 2102212464  ;;  %v336_v28 = vsel %vm328_vm4, %v315_v10, %v318_v12  ;;  %v340_v29 = vsel %vm328_vm4, %v318_v12, %v321_v15  ;;  %1838 = vperm.xlu0 %2289, %v1828_v39  }
 0x100   : > { %v334_v30 = vsel %vm330_vm6, %v318_v12, %v333_v27  ;;  %v337_v31 = vsel %vm331_vm7, %v324_v20, 920167782  ;;  %v341_v32 = vsel %vm331_vm7, %v327_v21, 1326507024  ;;  %v416_v41 = vshrl.u32 %v2351_v48, %v415_v17  ;;  %v1830_v27 = vld [vmem:[%s3044_s2 + $0x40] sm:$0xff] }
 0x101   : > { %v338_v36 = vsel %vm330_vm6, %v321_v15, %v337_v31  ;;  %v342_v40 = vsel %vm330_vm6, %v324_v20, %v341_v32  ;;  %v418_v47 = vshrl.u32 %v2352_v50, %v415_v17  ;;  %v335_v51 = vsel %vm329_vm5, %v332_v24, %v334_v30  ;;  %v1875_v32 = vld [vmem:[%s3044_s2 + $0x48] sm:$0xff] }
 0x102   : > { %v339_v54 = vsel %vm329_vm5, %v336_v28, %v338_v36  ;;  %v343_v56 = vsel %vm329_vm5, %v340_v29, %v342_v40  ;;  %v421_v58 = vshrl.u32 %v2353_v53, %v415_v17  ;;  %v423_v4 = vshll.u32 %v2353_v53, %v2457_v44  ;;  %1843 = vperm.xlu1 %2290, %v1829_v18  }
 0x103   : > { %v2527_v59 = vmul.u32.u64.low %v2448_v37, %v343_v56  ;;  %v2528_v60 = vmul.u32.u64.high %v2448_v37, %v343_v56, %v2527_v59  ;;  %v2531_v62 = vmul.u32.u64.low %v2448_v37, %v339_v54  ;;  %v2532_v63 = vmul.u32.u64.high %v2448_v37, %v339_v54, %v2531_v62  ;;  %1848 = vperm.xlu0 %2289, %v1830_v27  }
 0x104   : > { %v419_v1 = vor.u32 %v418_v47, %v417_v22  ;;  %v422_v3 = vor.u32 %v421_v58, %v420_v33  ;;  %v424_v7 = vshrl.u32 %v2354_v55, %v415_v17  ;;  %v351_v8 = vmul.u32 %v2448_v37, %v335_v51 }
 0x105   : > { %v426_v10 = vshll.u32 %v2354_v55, %v2457_v44  ;;  %v427_v12 = vshrl.u32 %v2355_v57, %v415_v17  ;;  %v430_v15 = vshrl.u32 %v2356_v6, %v415_v17  ;;  %v429_v21 = vshll.u32 %v2355_v57, %v2457_v44 }
 0x106   : > { %v425_v20 = vor.u32 %v424_v7, %v423_v4  ;;  %vm432_vm9 = vcmp.lt.s32.totalorder %v2455_v43, 1  ;;  %vm433_vm10 = vcmp.lt.s32.totalorder %v2455_v43, 2  ;;  %vm353_vm11 = vc.u32 %v2528_v60, %v2531_v62  ;;  %1881 = vperm.xlu1 %2290, %v1875_v32  }
 0x107   : > { %v354_v37 = vadd.s32 1, %v2532_v63  ;;  %v428_v22 = vor.u32 %v427_v12, %v426_v10  ;;  %vm434_vm12 = vcmp.lt.s32.totalorder %v2455_v43, 3  ;;  %v431_v17 = vor.u32 %v430_v15, %v429_v21 }
 0x108   : > { %vm435_vm13 = vcmp.lt.s32.totalorder %v2455_v43, 4  ;;  %v436_v24 = vsel %vm432_vm9, %v416_v41, %v419_v1  ;;  %v440_v44 = vsel %vm432_vm9, %v419_v1, %v422_v3  ;;  %v444_v31 = vsel %vm432_vm9, %v422_v3, %v425_v20  ;;  %v1877_v43 = vld [vmem:[%s3044_s2 + $0x58] sm:$0xff] }
 0x109   : > { %v355_v28 = vsel %vm353_vm11, %v354_v37, %v2532_v63  ;;  %v437_v29 = vsel %vm435_vm13, %v425_v20, 2102212464  ;;  %v441_v30 = vsel %vm435_vm13, %v428_v22, 920167782  ;;  %v445_v40 = vsel %vm435_vm13, %v431_v17, 1326507024 }
 0x10a   : > { %v356_v33 = vadd.s32 %v355_v28, %v351_v8  ;;  %v438_v35 = vsel %vm434_vm12, %v422_v3, %v437_v29  ;;  %v442_v36 = vsel %vm434_vm12, %v425_v20, %v441_v30  ;;  %v446_v49 = vsel %vm434_vm12, %v428_v22, %v445_v40  ;;  %v1876_v63 = vld [vmem:[%s3044_s2 + $0x50] sm:$0xff]  ;;  %1891 = vperm.xlu1 %2290, %v1877_v43  }
 0x10b   : > { %v439_v41 = vsel %vm433_vm10, %v436_v24, %v438_v35  ;;  %v443_v47 = vsel %vm433_vm10, %v440_v44, %v442_v36  ;;  %v516_v51 = vsel %vm515_vm8, %v2460_v46, 0  ;;  %v447_v56 = vsel %vm433_vm10, %v444_v31, %v446_v49  ;;  %1886 = vperm.xlu0 %2289, %v1876_v63  }
 0x10c   : > { %v357_v54 = vadd.s32 536870912, %v356_v33  ;;  %v2585_v58 = vmul.u32.u64.low %v2453_v42, %v443_v47  ;;  %v2586_v59 = vmul.u32.u64.high %v2453_v42, %v443_v47, %v2585_v58  ;;  %v2596_v46 = vshrl.u32 %v516_v51, 5 }
 0x10d   : > { %v2593_v1 = vmul.u32.u64.low %v2453_v42, %v447_v56  ;;  %v2594_v3 = vmul.u32.u64.high %v2453_v42, %v447_v56, %v2593_v1  ;;  %v2599_v4 = vmul.f32 0.6931472, %v2476_v61  ;;  %v518_v39 = vand.u32 31, %v516_v51 }
 0x10e   : > { %v2604_v7 = vshrl.u32 %v357_v54, 30  ;;  %v2608_v8 = vand.u32 8388607, %v608_v38  ;;  %v2612_v10 = vadd.s32 %v2531_v62, %v2528_v60  ;;  %v455_v12 = vmul.u32 %v2453_v42, %v439_v41  ;;  %v2654_v54 = vpop.eup %2308 }
 0x10f   : > { %v2617_v61 = vshll.u32 %v512_v45, 8  ;;  %v2146_v15 = vadd.s32 4294967169, %v2464_v52  ;;  %v458_v20 = vadd.s32 1, %v2586_v59  ;;  %v519_v21 = vsub.s32 32, %v518_v39  ;;  %v1981_v45 = vld [vmem:[%s3044_s2 + $0x68] sm:$0x7]  ;;  %1896 = vperm.xlu0 %2289, %v1878_v19  }
 0x110   : > { %v359_v18 = vshll.u32 %v2604_v7, 30  ;;  %vm536_vm14 = vcmp.lt.s32.totalorder %v2596_v46, 1  ;;  %vm457_vm15 = vc.u32 %v2594_v3, %v2585_v58  ;;  %v521_v34 = vshll.u32 %v2351_v48, %v518_v39  ;;  %1984 = vperm.xlu1 %2290, %v1981_v45  }
 0x111   : > { %v524_v42 = vshll.u32 %v2352_v50, %v518_v39  ;;  %vm537_vm0 = vcmp.lt.s32.totalorder %v2596_v46, 2  ;;  %v459_v60 = vsel %vm457_vm15, %v458_v20, %v2586_v59  ;;  %v520_v62 = vshrl.u32 %v2351_v48, %v519_v21 }
 0x112   : > { %v2634_v52 = vsub.s32 %v356_v33, %v359_v18  ;;  %vm538_vm1 = vcmp.lt.s32.totalorder %v2596_v46, 3  ;;  %v460_v37 = vadd.s32 %v459_v60, %v455_v12  ;;  %v522_v22 = vshrl.u32 %v2352_v50, %v519_v21 }
 0x113   : > { %v525_v17 = vshrl.u32 %v2353_v53, %v519_v21  ;;  %v527_v24 = vshll.u32 %v2353_v53, %v518_v39  ;;  %v528_v27 = vshrl.u32 %v2354_v55, %v519_v21  ;;  %v530_v28 = vshll.u32 %v2354_v55, %v518_v39 }
 0x114   : > { %v362_v44 = vsub.s32 0, %v2634_v52  ;;  %v531_v29 = vshrl.u32 %v2355_v57, %v519_v21  ;;  %v461_v30 = vadd.s32 536870912, %v460_v37  ;;  %v523_v31 = vor.u32 %v522_v22, %v521_v34 }
 0x115   : > { %v526_v32 = vor.u32 %v525_v17, %v524_v42  ;;  %v533_v33 = vshll.u32 %v2355_v57, %v518_v39  ;;  %v529_v36 = vor.u32 %v528_v27, %v527_v24  ;;  %v534_v41 = vshrl.u32 %v2356_v6, %v519_v21 }
 0x116   : > { %v2135_v35 = vmin.u32 %v362_v44, %v2634_v52  ;;  %v532_v40 = vor.u32 %v531_v29, %v530_v28  ;;  %v462_v47 = vshrl.u32 %v461_v30, 30  ;;  %vm539_vm2 = vcmp.lt.s32.totalorder %v2596_v46, 4 }
 0x117   : > { %v540_v49 = vsel %vm536_vm14, %v520_v62, %v523_v31  ;;  %v544_v51 = vsel %vm536_vm14, %v523_v31, %v526_v32  ;;  %v535_v59 = vor.u32 %v534_v41, %v533_v33  ;;  %v541_v63 = vsel %vm539_vm2, %v529_v36, 2102212464 }
 0x118   : > { %v364_v56 = vclz %v2135_v35  ;;  %v545_v1 = vsel %vm539_vm2, %v532_v40, 920167782  ;;  %v463_v43 = vshll.u32 %v462_v47, 30  ;;  %v542_v39 = vsel %vm538_vm1, %v526_v32, %v541_v63 }
 0x119   : > { %v546_v12 = vsel %vm538_vm1, %v529_v36, %v545_v1  ;;  %v618_v18 = vadd.s32 1, %v2146_v15  ;;  %v543_v21 = vsel %vm537_vm0, %v540_v49, %v542_v39  ;;  %v548_v34 = vsel %vm536_vm14, %v526_v32, %v529_v36 }
 0x11a   : > { %v2136_v20 = vadd.s32 4294967294, %v364_v56  ;;  %v547_v19 = vsel %vm537_vm0, %v544_v51, %v546_v12  ;;  %v2671_v42 = vsub.s32 %v460_v37, %v463_v43  ;;  %v486_v45 = vsub.s32 4, %v462_v47 }
 0x11b   : > { %v549_v60 = vsel %vm539_vm2, %v535_v59, 1326507024  ;;  %v559_v62 = vmul.u32 %v2617_v61, %v543_v21  ;;  %v2679_v22 = vmul.u32.u64.low %v2617_v61, %v547_v19  ;;  %v2680_v17 = vmul.u32.u64.high %v2617_v61, %v547_v19, %v2679_v22 }
 0x11c   : > { %vm2137_vm4 = vcmp.lt.s32.totalorder %v2136_v20, 0  ;;  %v550_v15 = vsel %vm538_vm1, %v532_v40, %v549_v60  ;;  %v466_v44 = vsub.s32 0, %v2671_v42  ;;  %vm619_vm5 = vcmp.gt.s32.totalorder %v618_v18, 0 }
 0x11d   : > { %v367_v24 = vsel %vm2137_vm4, 0, %v2136_v20  ;;  %v551_v37 = vsel %vm537_vm0, %v548_v34, %v550_v15  ;;  %v616_v29 = vor.u32 8388608, %v2608_v8  ;;  %v620_v30 = vsel %vm619_vm5, %v618_v18, 0 }
 0x11e   : > { %v368_v27 = vsub.s32 32, %v367_v24  ;;  %v372_v28 = vsub.s32 4294967266, %v367_v24  ;;  %v369_v31 = vshll.u32 %v2634_v52, %v367_v24  ;;  %v2139_v32 = vmin.u32 %v466_v44, %v2671_v42 }
 0x11f   : > { %v2689_v33 = vmul.u32.u64.low %v2617_v61, %v551_v37  ;;  %v2690_v35 = vmul.u32.u64.high %v2617_v61, %v551_v37, %v2689_v33  ;;  %v562_v46 = vadd.s32 1, %v2680_v17  ;;  %v622_v41 = vand.u32 31, %v620_v30 }
 0x120   : > { %v370_v36 = vshrl.u32 %v2612_v10, %v368_v27  ;;  %v373_v40 = vadd.s32 127, %v372_v28  ;;  %v456_v49 = vadd.s32 %v2585_v58, %v2594_v3  ;;  %v468_v51 = vclz %v2139_v32 }
 0x121   : > { %v2698_v56 = vsel %vm402_vm3, %v486_v45, %v462_v47  ;;  %v2700_v52 = vshrl.u32 %v620_v30, 5  ;;  %v623_v61 = vsub.s32 32, %v622_v41  ;;  %v625_v1 = vshll.u32 %v2351_v48, %v622_v41 }
 0x122   : > { %v371_v59 = vor.u32 %v370_v36, %v369_v31  ;;  %v374_v63 = vshll.u32 %v373_v40, 23  ;;  %vm298_vm6 = vcmp.lt.s32.totalorder %v2418_v9, 0  ;;  %v2140_v10 = vadd.s32 4294967294, %v468_v51 }
 0x123   : > { %v2705_v43 = vadd.s32 %v2679_v22, %v2690_v35  ;;  %vm561_vm7 = vc.u32 %v2690_v35, %v2679_v22  ;;  %v628_v58 = vshll.u32 %v2352_v50, %v622_v41  ;;  %vm2711_vm8 = vcmp.le.f32.partialorder %v296_v11, 0.7853982 }
 0x124   : > { %v375_v47 = vor.u32 4788187, %v374_v63  ;;  %v378_v39 = vcvt.s32.f32 %v371_v59  ;;  %v563_v12 = vsel %vm561_vm7, %v562_v46, %v2680_v17  ;;  %v624_v18 = vshrl.u32 %v2351_v48, %v623_v61 }
 0x125   : > { %vm2141_vm9 = vcmp.lt.s32.totalorder %v2140_v10, 0  ;;  %vm3046_vm10 = vcmp.lt.s32.totalorder %v2427_v16, 0  ;;  %v564_v20 = vadd.s32 %v563_v12, %v559_v62  ;;  %v626_v21 = vshrl.u32 %v2352_v50, %v623_v61 }
 0x126   : > { %v629_v19 = vshrl.u32 %v2353_v53, %v623_v61  ;;  %vm640_vm11 = vcmp.lt.s32.totalorder %v2700_v52, 1  ;;  %v376_v11 = vand.u32 2147483647, %v375_v47  ;;  %v471_v34 = vsel %vm2141_vm9, 0, %v2140_v10 }
 0x127   : > { %vm2723_vm12 = vcmp.le.f32.partialorder %v504_v25, 0.7853982  ;;  %v631_v48 = vshll.u32 %v2353_v53, %v622_v41  ;;  %v632_v60 = vshrl.u32 %v2354_v55, %v623_v61  ;;  %v472_v15 = vsub.s32 32, %v471_v34 }
 0x128   : > { %v473_v62 = vshll.u32 %v2671_v42, %v471_v34  ;;  %v476_v50 = vsub.s32 4294967266, %v471_v34  ;;  %v565_v22 = vadd.s32 536870912, %v564_v20  ;;  %v379_v17 = vmul.f32 %v378_v39, %v376_v11 }
 0x129   : > { %v627_v24 = vor.u32 %v626_v21, %v625_v1  ;;  %v630_v44 = vor.u32 %v629_v19, %v628_v58  ;;  %v633_v37 = vor.u32 %v632_v60, %v631_v48  ;;  %v474_v27 = vshrl.u32 %v456_v49, %v472_v15 }
 0x12a   : > { %v477_v28 = vadd.s32 127, %v476_v50  ;;  %v566_v30 = vshrl.u32 %v565_v22, 30  ;;  %v634_v25 = vshll.u32 %v2354_v55, %v622_v41  ;;  %v380_v31 = vxor.u32 2147483648, %v379_v17 }
 0x12b   : > { %v635_v32 = vshrl.u32 %v2355_v57, %v623_v61  ;;  %v637_v53 = vshll.u32 %v2355_v57, %v622_v41  ;;  %v638_v33 = vshrl.u32 %v2356_v6, %v623_v61  ;;  %v475_v35 = vor.u32 %v474_v27, %v473_v62 }
 0x12c   : > { %v478_v42 = vshll.u32 %v477_v28, 23  ;;  %v567_v36 = vshll.u32 %v566_v30, 30  ;;  %v590_v40 = vsub.s32 4, %v566_v30  ;;  %v381_v46 = vsel %vm298_vm6, %v380_v31, %v379_v17 }
 0x12d   : > { %v636_v51 = vor.u32 %v635_v32, %v634_v25  ;;  %v639_v49 = vor.u32 %v638_v33, %v637_v53  ;;  %vm642_vm13 = vcmp.lt.s32.totalorder %v2700_v52, 3  ;;  %v384_v55 = vsel %vm2711_vm8, %v2418_v9, %v381_v46 }
 0x12e   : > { %v479_v59 = vor.u32 4788187, %v478_v42  ;;  %v2740_v63 = vsub.s32 %v564_v20, %v567_v36  ;;  %vm643_vm14 = vcmp.lt.s32.totalorder %v2700_v52, 4  ;;  %v482_v57 = vcvt.s32.f32 %v475_v35 }
 0x12f   : > { %v591_v6 = vsel %vm3046_vm10, %v590_v40, %v566_v30  ;;  %v644_v41 = vsel %vm640_vm11, %v624_v18, %v627_v24  ;;  %v645_v61 = vsel %vm643_vm14, %v633_v37, 2102212464  ;;  %2310 = vcosq.f32 %v384_v55 }
 0x130   : > { %v480_v1 = vand.u32 2147483647, %v479_v59  ;;  %v570_v10 = vsub.s32 0, %v2740_v63  ;;  %v2752_v58 = vsel %vm2723_vm12, 0, %v591_v6  ;;  %2312 = vsinq.f32 %v384_v55 }
 0x131   : > { %vm641_vm15 = vcmp.lt.s32.totalorder %v2700_v52, 2  ;;  %v646_v47 = vsel %vm642_vm13, %v630_v44, %v645_v61  ;;  %v648_v39 = vsel %vm640_vm11, %v627_v24, %v630_v44  ;;  %v649_v21 = vsel %vm643_vm14, %v636_v51, 920167782 }
 0x132   : > { %v483_v12 = vmul.f32 %v482_v57, %v480_v1  ;;  %v2143_v18 = vmin.u32 %v570_v10, %v2740_v63  ;;  %v647_v20 = vsel %vm641_vm15, %v644_v41, %v646_v47  ;;  %vm2764_vm0 = vcmp.le.f32.partialorder %v400_v14, 0.7853982 }
 0x133   : > { %v650_v11 = vsel %vm642_vm13, %v633_v37, %v649_v21  ;;  %v652_v34 = vsel %vm640_vm11, %v630_v44, %v633_v37  ;;  %v653_v48 = vsel %vm643_vm14, %v639_v49, 1326507024  ;;  %v656_v14 = vshll.u32 %v616_v29, 8 }
 0x134   : > { %v484_v60 = vxor.u32 2147483648, %v483_v12  ;;  %v572_v15 = vclz %v2143_v18  ;;  %v651_v62 = vsel %vm641_vm15, %v648_v39, %v650_v11  ;;  %v654_v50 = vsel %vm642_vm13, %v636_v51, %v653_v48 }
 0x135   : > { %v655_v22 = vsel %vm641_vm15, %v652_v34, %v654_v50  ;;  %v489_v17 = vsel %vm2764_vm0, 0, %v2698_v56  ;;  %v2782_v24 = vadd.f32 1.0, %v2438_v23  ;;  %v382_v44 = vsub.s32 4, %v2604_v7 }
 0x136   : > { %v485_v37 = vsel %vm402_vm3, %v484_v60, %v483_v12  ;;  %v2144_v27 = vadd.s32 4294967294, %v572_v15  ;;  %v493_v28 = vadd.s32 3, %v489_v17  ;;  %v663_v30 = vmul.u32 %v656_v14, %v647_v20 }
 0x137   : > { %v488_v52 = vsel %vm2764_vm0, %v2423_v13, %v485_v37  ;;  %v2790_v8 = vmul.u32.u64.low %v656_v14, %v655_v22  ;;  %v2791_v29 = vmul.u32.u64.high %v656_v14, %v655_v22, %v2790_v8  ;;  %v2798_v32 = vand.u32 3, %v489_v17 }
 0x138   : > { %2314 = vcosq.f32 %v488_v52  ;;  %vm2145_vm1 = vcmp.lt.s32.totalorder %v2144_v27, 0  ;;  %v2793_v56 = vmul.u32.u64.low %v656_v14, %v651_v62  ;;  %v2794_v23 = vmul.u32.u64.high %v656_v14, %v651_v62, %v2793_v56 }
 0x139   : > { %2316 = vsinq.f32 %v488_v52  ;;  %v575_v25 = vsel %vm2145_vm1, 0, %v2144_v27  ;;  %v2796_v31 = vand.u32 3, %v493_v28  ;;  %v2800_v53 = vpop.eup %2310  ;;  %v383_v33 = vsel %vm298_vm6, %v382_v44, %v2604_v7 }
 0x13a   : > { %v576_v35 = vsub.s32 32, %v575_v25  ;;  %v580_v42 = vsub.s32 4294967266, %v575_v25  ;;  %v223_v36 = vand.u32 2147483647, %v2411_v5  ;;  %v2806_v40 = vpop.eup %2312  ;;  %v2809_v46 = vadd.s32 %v2793_v56, %v2791_v29 }
 0x13b   : > { %vm665_vm2 = vc.u32 %v2791_v29, %v2793_v56  ;;  %v229_v51 = vmul.f32 -0.5, %v2408_v2  ;;  %v232_v49 = vand.u32 2147483647, %v2408_v2  ;;  %v577_v55 = vshll.u32 %v2740_v63, %v575_v25 }
 0x13c   : > { %v578_v59 = vshrl.u32 %v2705_v43, %v576_v35  ;;  %v581_v7 = vadd.s32 127, %v580_v42  ;;  %v666_v57 = vadd.s32 1, %v2794_v23  ;;  %vm496_vm3 = vcmp.eq.s32.totalorder %v2796_v31, 0 }
 0x13d   : > { %vm910_vm4 = vcmp.eq.s32.totalorder %v2798_v32, 0  ;;  %v385_v6 = vsel %vm2711_vm8, 0, %v383_v33  ;;  %vm610_vm5 = vcmp.lt.s32.totalorder %v2441_v26, 0  ;;  %vm495_vm6 = vcmp.lt.s32.totalorder %v2796_v31, 2 }
 0x13e   : > { %v579_v41 = vor.u32 %v578_v59, %v577_v55  ;;  %v582_v61 = vshll.u32 %v581_v7, 23  ;;  %v667_v1 = vsel %vm665_vm2, %v666_v57, %v2794_v23  ;;  %vm909_vm7 = vcmp.lt.s32.totalorder %v2798_v32, 2 }
 0x13f   : > { %v389_v43 = vadd.s32 3, %v385_v6  ;;  %vm2827_vm9 = vcmp.le.f32.partialorder %v608_v38, 0.7853982  ;;  %v668_v10 = vadd.s32 %v667_v1, %v663_v30  ;;  %v393_v3 = vxor.u32 2147483648, %v2806_v40 }
 0x140   : > { %v396_v47 = vxor.u32 2147483648, %v2800_v53  ;;  %v805_v39 = vand.u32 3, %v385_v6  ;;  %v583_v12 = vor.u32 4788187, %v582_v61  ;;  %vm499_vm11 = vcmp.eq.s32.totalorder %v2796_v31, 2 }
 0x141   : > { %vm913_vm13 = vcmp.eq.s32.totalorder %v2798_v32, 2  ;;  %vm388_vm14 = vweird.f32 %v2418_v9  ;;  %v390_v18 = vand.u32 3, %v389_v43  ;;  %v586_v38 = vcvt.s32.f32 %v579_v41 }
 0x142   : > { %v669_v20 = vadd.s32 536870912, %v668_v10  ;;  %v228_v21 = vmul.f32 0.6931472, %v2654_v54  ;;  %v230_v19 = vadd.f32 1.0, %v229_v51  ;;  %v2315_v11 = vpop.eup %2314  ;;  %v584_v34 = vand.u32 2147483647, %v583_v12 }
 0x143   : > { %vm391_vm0 = vcmp.lt.s32.totalorder %v390_v18, 2  ;;  %vm392_vm1 = vcmp.eq.s32.totalorder %v390_v18, 0  ;;  %vm395_vm2 = vcmp.eq.s32.totalorder %v390_v18, 2  ;;  %vm806_vm8 = vcmp.lt.s32.totalorder %v805_v39, 2  ;;  %v2317_v48 = vpop.eup %2316 }
 0x144   : > { %v670_v60 = vshrl.u32 %v669_v20, 30  ;;  %v500_v15 = vxor.u32 2147483648, %v2315_v11  ;;  %v394_v62 = vsel %vm392_vm1, %v2800_v53, %v393_v3  ;;  %v397_v50 = vsel %vm395_vm2, %v396_v47, %v2806_v40 }
 0x145   : > { %v587_v22 = vmul.f32 %v586_v38, %v584_v34  ;;  %v497_v14 = vxor.u32 2147483648, %v2317_v48  ;;  %v398_v17 = vsel %vm391_vm0, %v394_v62, %v397_v50  ;;  %vm807_vm15 = vcmp.eq.s32.totalorder %v805_v39, 0 }
 0x146   : > { %v671_v54 = vshll.u32 %v670_v60, 30  ;;  %v694_v44 = vsub.s32 4, %v670_v60  ;;  %v501_v37 = vsel %vm499_vm11, %v500_v15, %v2317_v48  ;;  %v915_v27 = vsel %vm913_vm13, %v500_v15, %v2317_v48 }
 0x147   : > { %vm1320_vm10 = vcmask 1041408   ;;  %v588_v28 = vxor.u32 2147483648, %v587_v22  ;;  %v498_v52 = vsel %vm496_vm3, %v2315_v11, %v497_v14  ;;  %v912_v8 = vsel %vm910_vm4, %v2315_v11, %v497_v14 }
 0x148   : > { %v809_v29 = vsel %vm807_vm15, %v2800_v53, %v393_v3  ;;  %v2849_v30 = vsub.s32 %v668_v10, %v671_v54  ;;  %v695_v56 = vsel %vm610_vm5, %v694_v44, %v670_v60  ;;  %v502_v23 = vsel %vm495_vm6, %v498_v52, %v501_v37 }
 0x149   : > { %v916_v25 = vsel %vm909_vm7, %v912_v8, %v915_v27  ;;  %vm3055_vm11 = vcmp.lt.s32.totalorder %v2427_v16, 0  ;;  %v2861_v35 = vsel %vm2827_vm9, 0, %v695_v56  ;;  %vm3056_vm3 = vweird.f32 %v2423_v13 }
 0x14a   : > { %v589_v33 = vsel %vm3055_vm11, %v588_v28, %v587_v22  ;;  %v503_v53 = vsel %vm3056_vm3, nan, %v502_v23  ;;  %vm3057_vm4 = vmmov %vm3056_vm3  ;;  %v674_v32 = vsub.s32 0, %v2849_v30  ;;  %v399_v51 = vsel %vm388_vm14, nan, %v398_v17  ;;  %v2293_v17 = vld [vmem:[%s3043_s1 + $0x20] sm:$0xff]  }
 0x14b   : > { %v917_v42 = vsel %vm3057_vm4, nan, %v916_v25  ;;  %v592_v31 = vsel %vm2723_vm12, %v2427_v16, %v589_v33  ;;  %vm810_vm6 = vcmp.eq.s32.totalorder %v805_v39, 2  ;;  %v1125_v55 = vpack.c.bf16 %v503_v53, %v503_v53  ;;  %v2294_v53 = vld [vmem:[%s3043_s1 + $0x8] sm:$0xff]  }
 0x14c   : > { %2318 = vcosq.f32 %v592_v31  ;;  %v2873_v59 = vpack.c.bf16 %v917_v42, %v917_v42  ;;  %v812_v7 = vsel %vm810_vm6, %v396_v47, %v2806_v40  ;;  %v2147_v13 = vmin.u32 %v674_v32, %v2849_v30 }
 0x14d   : > { %2320 = vsinq.f32 %v592_v31  ;;  %v813_v57 = vsel %vm806_vm8, %v809_v29, %v812_v7  ;;  %vm233_vm12 = vcmp.lt.f32.partialorder %v232_v49, 0.0004427343  ;;  %v597_v45 = vadd.s32 3, %v2752_v58 }
 0x14e   : > { %vm3058_vm7 = vcmask 1043456   ;;  %v814_v6 = vsel %vm388_vm14, nan, %v813_v57  ;;  %v1124_v41 = vpack.c.bf16 %v399_v51, %v399_v51  ;;  %v231_v40 = vmul.f32 %v230_v19, %v2408_v2  ;;  %v2292_v2 = vld [vmem:[%s3043_s1 + $0x18] sm:$0xff]   ;;  %v2295_v51 = vld [vmem:[%s3043_s1 + $0x10] sm:$0xff]  }
 0x14f   : > { %2168 = vmatprep.subr.msk.bf16.mxu1 %vm3058_vm7, %v2873_v59  ;;  %vm3059_vm13 = vmmov %vm3058_vm7  ;;  %v676_v61 = vclz %v2147_v13  ;;  %v1126_v1 = vpack.c.bf16 %v814_v6, %v814_v6  ;;  %v222_v43 = vmul.f32 %v2782_v24, %v2411_v5  ;;  %v2357_v10 = vmov 65535  }
 0x150   : > { %2180 = vmatprep.subr.msk.bf16.mxu0 %vm3059_vm13, %v1125_v55  ;;  %vm3060_vm8 = vcmask 1040384   ;;  %vm3061_vm15 = vmmov %vm3058_vm7  ;;  %vm224_vm0 = vcmp.lt.f32.partialorder %v223_v36, 0.0004427343  ;;  %v234_v47 = vsel %vm233_vm12, %v231_v40, %v228_v21  ;;  %v598_v24 = vand.u32 3, %v597_v45  ;;  %v2296_v45 = vld [vmem:[%s3043_s1 + $0x28] sm:$0xff]  }
 0x151   : > { %v1321_v49 = vsel %vm3060_vm8, 4294967295, %v2357_v10  ;;  %v1234_v3 = vsel %vm3061_vm15, %v1124_v41, 0  ;;  %v2148_v39 = vadd.s32 4294967294, %v676_v61  ;;  %vm3062_vm1 = vmmov %vm3058_vm7  ;;  %v1297_v12 = vpack.c.bf16 %v234_v47, %v234_v47  ;;  %v1397_v47 = vpop.permute.xlu0 %1396 }
 0x152   : > { %v2894_v9 = vsel %vm3062_vm1, %v1126_v1, 0  ;;  %1440 = vmatpush1.bf16.msra.mxu0 %v1234_v3  ;;  %vm1150_vm14 = vcmask 64512   ;;  %v1322_v18 = vsel %vm1320_vm10, %v1321_v49, 0  ;;  %vm3063_vm11 = vmmov %vm3062_vm1  ;;  %v225_v5 = vsel %vm224_vm0, %v222_v43, %v2599_v4 }
 0x153   : > { %1165 = vmatpush1.bf16.msra.mxu1 %v2894_v9  ;;  %vm2149_vm2 = vcmp.lt.s32.totalorder %v2148_v39, 0  ;;  %v1311_v36 = vrot.slane %v1297_v12, 2  ;;  %v1011_v38 = vand.u32 3, %v2752_v58  ;;  %v1296_v48 = vpack.c.bf16 %v225_v5, %v225_v5 }
 0x154   : > { %2173 = vmatprep.subr.msk.bf16.mxu1 %vm3063_vm11, %v1125_v55  ;;  %v679_v20 = vsel %vm2149_vm2, 0, %v2148_v39  ;;  %vm600_vm10 = vcmp.eq.s32.totalorder %v598_v24, 0  ;;  %vm603_vm3 = vcmp.eq.s32.totalorder %v598_v24, 2  ;;  %vm599_vm12 = vcmp.lt.s32.totalorder %v598_v24, 2 }
 0x155   : > { %v680_v21 = vsub.s32 32, %v679_v20  ;;  %v684_v19 = vsub.s32 4294967266, %v679_v20  ;;  %v1327_v11 = vand.u32 %v1322_v18, %v1311_v36  ;;  %v681_v15 = vshll.u32 %v2849_v30, %v679_v20  ;;  %v1402_v24 = vpop.permute.xlu0 %1401  ;;  %v1407_v20 = vpop.permute.xlu1 %1406 }
 0x156   : > { %2169 = vmatmul.mubr.msk.bf16.vlgmr.msra.gmra.mrb[0].mxu1 %vm1150_vm14, %v2292_v2  ;;  %v2319_v34 = vpop.eup %2318  ;;  %vm1013_vm4 = vcmp.eq.s32.totalorder %v1011_v38, 0  ;;  %vm1016_vm6 = vcmp.eq.s32.totalorder %v1011_v38, 2  ;;  %vm1012_vm7 = vcmp.lt.s32.totalorder %v1011_v38, 2  ;;  %vm596_vm13 = vweird.f32 %v2427_v16 }
 0x157   : > { %1240 = vmatpush1.bf16.msra.mxu1 %v1234_v3  ;;  %1206 = vmatprep.mubr.bf16.mxu1 %v2350_v0  ;;  %v2321_v60 = vpop.eup %2320  ;;  %v682_v4 = vshrl.u32 %v2809_v46, %v680_v21  ;;  %v685_v62 = vadd.s32 127, %v684_v19  ;;  %v604_v58 = vxor.u32 2147483648, %v2319_v34  ;;  %v1310_v23 = vrot.slane %v1296_v48, 2  ;;  %v2297_v3 = vld [vmem:[%s3043_s1 + $0x30] sm:$0xff]  }
 0x158   : > { %1329 = vmatprep.subr.bf16.mxu1 %v1327_v11  ;;  %v601_v50 = vxor.u32 2147483648, %v2321_v60  ;;  %v701_v32 = vadd.s32 3, %v2861_v35  ;;  %v1114_v7 = vand.u32 3, %v2861_v35  ;;  %vm700_vm11 = vweird.f32 %v2441_v26 }
 0x159   : > { %v683_v22 = vor.u32 %v682_v4, %v681_v15  ;;  %v686_v14 = vshll.u32 %v685_v62, 23  ;;  %v605_v54 = vsel %vm603_vm3, %v604_v58, %v2321_v60  ;;  %v1018_v44 = vsel %vm1016_vm6, %v604_v58, %v2321_v60 }
 0x15a   : > { %v602_v37 = vsel %vm600_vm10, %v2319_v34, %v601_v50  ;;  %v1015_v46 = vsel %vm1013_vm4, %v2319_v34, %v601_v50  ;;  %v1324_v16 = vand.u32 %v1322_v18, %v1310_v23  ;;  %v702_v55 = vand.u32 3, %v701_v32 }
 0x15b   : > { %v687_v27 = vor.u32 4788187, %v686_v14  ;;  %v606_v28 = vsel %vm599_vm12, %v602_v37, %v605_v54  ;;  %v1019_v52 = vsel %vm1012_vm7, %v1015_v46, %v1018_v44  ;;  %v690_v56 = vcvt.s32.f32 %v683_v22 }
 0x15c   : > { %v2913_v8 = vsel %vm596_vm13, nan, %v606_v28  ;;  %v2915_v29 = vsel %vm596_vm13, nan, %v1019_v52  ;;  %vm1119_vm8 = vcmp.eq.s32.totalorder %v1114_v7, 2  ;;  %vm704_vm15 = vcmp.eq.s32.totalorder %v702_v55, 0 }
 0x15d   : > { %v688_v30 = vand.u32 2147483647, %v687_v27  ;;  %vm1116_vm0 = vcmp.eq.s32.totalorder %v1114_v7, 0  ;;  %vm703_vm1 = vcmp.lt.s32.totalorder %v702_v55, 2  ;;  %vm1115_vm2 = vcmp.lt.s32.totalorder %v1114_v7, 2 }
 0x15e   : > { %2170 = vmatmul.mubr.msk.bf16.gmra.mrb[4].mxu1 %vm1150_vm14, %v2293_v17  ;;  %vm1480_vm10 = vcmask 261120   ;;  %vm3064_vm3 = vcmask 1043456  }
 0x15f   : > { %1271 = vmatprep.mubr.bf16.mxu1 %v2350_v0  ;;  %v691_v25 = vmul.f32 %v690_v56, %v688_v30  ;;  %v1430_v56 = vld [vmem:[%s3043_s1 + $0x38] sm:$0xf]  ;;  %vm3065_vm4 = vmmov %vm3064_vm3 }
 0x160   : > { %vm3066_vm6 = vmmov %vm3064_vm3 }
 0x161   : > { %v692_v33 = vxor.u32 2147483648, %v691_v25  ;;  %vm3067_vm12 = vmmov %vm3064_vm3 }
 0x162   : > { %vm3068_vm7 = vmmov %vm3064_vm3 }
 0x163   : > { %v693_v42 = vsel %vm610_vm5, %v692_v33, %v691_v25  ;;  %vm1312_vm5 = vcmask 23552   ;;  %v1128_v25 = vpack.c.bf16 %v2913_v8, %v2913_v8  ;;  %v1525_v33 = vld [vmem:[%s3043_s1 + $0x48] sm:$0xf]  ;;  %vm3069_vm13 = vmmov %vm3064_vm3 }
 0x164   : > { %v696_v31 = vsel %vm2827_vm9, %v2441_v26, %v693_v42  ;;  %vm707_vm9 = vcmp.eq.s32.totalorder %v702_v55, 2  ;;  %v1435_v26 = vld [vmem:[%s3043_s1 + $0x40] sm:$0xf]  ;;  %v2299_v8 = vld [vmem:[%s3043_s1 + $0x68] sm:$0xff]  }
 0x165   : > { %2322 = vcosq.f32 %v696_v31  ;;  %2181 = vmatmul.mubr.msk.bf16.vlgmr.msra.gmra.mrb[4].mxu0 %vm1150_vm14, %v1435_v26 }
 0x166   : > { %2174 = vmatmul.mubr.msk.bf16.vlgmr.msra.gmra.mrb[0].mxu1 %vm1150_vm14, %v2294_v53  ;;  %2324 = vsinq.f32 %v696_v31  ;;  %1516 = vmatprep.mubr.bf16.mxu0 %v2350_v0  ;;  %v2298_v31 = vld [vmem:[%s3043_s1 + $0x60] sm:$0xff]  }
 0x167   : > { %1281 = vmatprep.mubr.bf16.mxu1 %v2350_v0  ;;  %1330 = vmatpush1.bf16.msra.mxu1 %v1324_v16 }
 0x16e   : > { %2175 = vmatmul.mubr.msk.bf16.gmra.mrb[4].mxu1 %vm1150_vm14, %v2295_v51 }
 0x16f   : > { %1361 = vmatprep.mubr.bf16.mxu1 %v2350_v0  ;;  %v2323_v63 = vpop.eup %2322 }
 0x170   : > { %v2325_v13 = vpop.eup %2324  ;;  %v708_v57 = vxor.u32 2147483648, %v2323_v63 }
 0x171   : > { %v705_v6 = vxor.u32 2147483648, %v2325_v13  ;;  %v1412_v50 = vpop.permute.xlu1 %1411 }
 0x172   : > { %v709_v41 = vsel %vm707_vm9, %v708_v57, %v2325_v13  ;;  %v1121_v40 = vsel %vm1119_vm8, %v708_v57, %v2325_v13 }
 0x173   : > { %v706_v35 = vsel %vm704_vm15, %v2323_v63, %v705_v6  ;;  %v1118_v61 = vsel %vm1116_vm0, %v2323_v63, %v705_v6 }
 0x174   : > { %v710_v1 = vsel %vm703_vm1, %v706_v35, %v709_v41  ;;  %v1122_v43 = vsel %vm1115_vm2, %v1118_v61, %v1121_v40  ;;  %v1576_v41 = vpop.permute.xlu0 %1575 }
 0x175   : > { %v711_v10 = vsel %vm700_vm11, nan, %v710_v1  ;;  %v2941_v49 = vsel %vm700_vm11, nan, %v1122_v43 }
 0x176   : > { %2178 = vmatmul.mubr.msk.bf16.vlgmr.msra.gmra.mrb[0].mxu1 %vm1312_vm5, %v2296_v45  ;;  %v1129_v23 = vpack.c.bf16 %v711_v10, %v711_v10 }
 0x177   : > { %1371 = vmatprep.mubr.bf16.mxu1 %v2350_v0 }
 0x17e   : > { %2179 = vmatmul.mubr.msk.bf16.gmra.mrb[4].mxu1 %vm1312_vm5, %v2297_v3  ;;  %vm3070_vm5 = vmmov %vm3064_vm3 }
 0x17f   : > { %1947 = vmatprep.mubr.bf16.mxu1 %v2350_v0 }
 0x238   : > { %v1473_v53 = vpop.f32.mrb[4].mxu0 }
 0x249   : > { %v1363_v39 = vpop.f32.mrb[0].mxu1 }
 0x24a   : > { %v1414_v2 = vadd.f32 %v1397_v47, %v1363_v39  ;;  %v1365_v12 = vpop.f32.mrb[1].mxu1  ;;  %v2300_v39 = vld [vmem:[%s3043_s1 + $0x50] sm:$0xff]  }
 0x24b   : > { %v1415_v18 = vadd.f32 %v1397_v47, %v1365_v12  ;;  %v1367_v5 = vpop.f32.mrb[2].mxu1  ;;  %v1131_v47 = vpack.c.bf16 %v2941_v49, %v2941_v49  ;;  %v2301_v49 = vld [vmem:[%s3043_s1 + $0x58] sm:$0xff]  }
 0x24c   : > { %v1416_v36 = vadd.f32 %v1402_v24, %v1367_v5  ;;  %v1369_v38 = vpop.f32.mrb[3].mxu1  ;;  %v1422_v19 = vmax.f32 %v1414_v2, 0.0  ;;  %v1130_v2 = vpack.c.bf16 %v2915_v29, %v2915_v29  ;;  %v2302_v29 = vld [vmem:[%s3043_s1 + $0x70] sm:$0xff]  }
 0x24d   : > { %v1417_v21 = vadd.f32 %v1402_v24, %v1369_v38  ;;  %v1423_v34 = vmax.f32 %v1415_v18, 0.0  ;;  %v2303_v24 = vld [vmem:[%s3043_s1 + $0x78] sm:$0xff]   ;;  %v1834_v18 = vpop.permute.xlu1 %1833 }
 0x24e   : > { %v1424_v11 = vmax.f32 %v1416_v36, 0.0  ;;  %v1761_v12 = vsel %vm3070_vm5, %v1130_v2, 0 }
 0x24f   : > { %v1425_v48 = vmax.f32 %v1417_v21, 0.0 }
 0x250   : > { %v1431_v60 = vpack.c.bf16 %v1424_v11, %v1422_v19 }
 0x251   : > { %v1432_v15 = vpack.c.bf16 %v1425_v48, %v1423_v34  ;;  %v1373_v4 = vpop.f32.mrb[4].mxu1 }
 0x252   : > { %v1418_v62 = vadd.f32 %v1407_v20, %v1373_v4  ;;  %v1375_v58 = vpop.f32.mrb[5].mxu1 }
 0x253   : > { %v1419_v22 = vadd.f32 %v1407_v20, %v1375_v58  ;;  %v1377_v14 = vpop.f32.mrb[6].mxu1  ;;  %1484 = vmatprep.subr.bf16.mxu0 %v1432_v15  ;;  %v1839_v20 = vpop.permute.xlu0 %1838 }
 0x254   : > { %v1420_v17 = vadd.f32 %v1412_v50, %v1377_v14  ;;  %v1379_v54 = vpop.f32.mrb[7].mxu1  ;;  %1485 = vmatpush1.bf16.msra.mxu0 %v1431_v60  ;;  %v1426_v37 = vmax.f32 %v1418_v62, 0.0 }
 0x255   : > { %v1421_v44 = vadd.f32 %v1412_v50, %v1379_v54  ;;  %v1427_v27 = vmax.f32 %v1419_v22, 0.0  ;;  %v1844_v50 = vpop.permute.xlu1 %1843 }
 0x256   : > { %v1428_v46 = vmax.f32 %v1420_v17, 0.0 }
 0x257   : > { %v1429_v28 = vmax.f32 %v1421_v44, 0.0  ;;  %v1849_v44 = vpop.permute.xlu0 %1848 }
 0x258   : > { %v1433_v52 = vpack.c.bf16 %v1428_v46, %v1426_v37 }
 0x259   : > { %v1434_v30 = vpack.c.bf16 %v1429_v28, %v1427_v27 }
 0x25b   : > { %1486 = vmatprep.subr.bf16.mxu0 %v1434_v30 }
 0x25c   : > { %1487 = vmatpush1.bf16.msra.mxu0 %v1433_v52 }
 0x25d   : > { %2183 = vmatprep.subr.msk.bf16.mxu0 %vm3064_vm3, %v2873_v59  ;;  %v1607_v59 = vsel %vm3066_vm6, %v1128_v25, 0 }
 0x25f   : > { %2182 = vmatmul.mubr.msk.bf16.vlgmr.msra.gmra.mrb[8].mxu0 %vm1480_vm10, %v1430_v56 }
 0x260   : > { %1530 = vmatpush1.bf16.msra.mxu0 %v2894_v9  ;;  %1561 = vmatprep.mubr.bf16.mxu0 %v2350_v0  ;;  %v1475_v9 = vpop.f32.mrb[5].mxu0 }
 0x261   : > { %2187 = vmatprep.subr.msk.bf16.mxu0 %vm3065_vm4, %v1129_v23  ;;  %v1477_v16 = vpop.f32.mrb[6].mxu0 }
 0x262   : > { %v1478_v42 = vpop.f32.mrb[7].mxu0  ;;  %v1882_v16 = vpop.permute.xlu1 %1881 }
 0x267   : > { %2184 = vmatmul.mubr.msk.bf16.vlgmr.msra.gmra.mrb[12].mxu0 %vm1150_vm14, %v1525_v33 }
 0x268   : > { %1613 = vmatpush1.bf16.msra.mxu0 %v1607_v59  ;;  %1644 = vmatprep.mubr.bf16.mxu0 %v2350_v0 }
 0x26f   : > { %2188 = vmatmul.mubr.msk.bf16.vlgmr.msra.gmra.mrb[16].mxu0 %vm1150_vm14, %v2298_v31 }
 0x270   : > { %1654 = vmatprep.mubr.bf16.mxu0 %v2350_v0 }
 0x277   : > { %2189 = vmatmul.mubr.msk.bf16.gmra.mrb[20].mxu0 %vm1150_vm14, %v2299_v8 }
 0x278   : > { %1719 = vmatprep.mubr.bf16.mxu0 %v2350_v0 }
 0x332   : > { %v1518_v32 = vpop.f32.mrb[8].mxu0 }
 0x333   : > { %v1519_v51 = vadd.f32 %v1518_v32, %v1473_v53  ;;  %v1520_v55 = vpop.f32.mrb[9].mxu0  ;;  %v2304_v53 = vld [vmem:[%s3043_s1 + $0x80] sm:$0xff]   ;;  %v1887_v32 = vpop.permute.xlu0 %1886 }
 0x334   : > { %v1521_v7 = vadd.f32 %v1520_v55, %v1475_v9  ;;  %v1522_v63 = vpop.f32.mrb[10].mxu0  ;;  %v2305_v9 = vld [vmem:[%s3043_s1 + $0x88] sm:$0xff]  }
 0x335   : > { %v1523_v13 = vpop.f32.mrb[11].mxu0 }
 0x33a   : > { %v1563_v57 = vpop.f32.mrb[12].mxu0 }
 0x33b   : > { %v1570_v45 = vadd.f32 %v1563_v57, %v1519_v51  ;;  %v1565_v6 = vpop.f32.mrb[13].mxu0 }
 0x33c   : > { %v1571_v40 = vadd.f32 %v1565_v6, %v1521_v7  ;;  %v1567_v35 = vpop.f32.mrb[14].mxu0 }
 0x33d   : > { %v1578_v61 = vadd.f32 %v1576_v41, %v1570_v45  ;;  %v1568_v1 = vpop.f32.mrb[15].mxu0  ;;  %v1892_v35 = vpop.permute.xlu1 %1891 }
 0x33e   : > { %v1579_v43 = vadd.f32 %v1576_v41, %v1571_v40 }
 0x33f   : > { %v1584_v10 = vpack.c.bf16 %v1578_v61, %v1578_v61  ;;  %2031 = vst [vmem:[%s2986_s30] sm:$0xff] %v1578_v61 }
 0x340   : > { %v1585_v3 = vpack.c.bf16 %v1579_v43, %v1579_v43  ;;  %2032 = vst [vmem:[%s2986_s30 + $0x8] sm:$0xff] %v1579_v43 }
 0x341   : > { %v1682_v26 = vsel %vm3067_vm12, %v1584_v10, 0  ;;  %v1897_v10 = vpop.permute.xlu0 %1896 }
 0x342   : > { %2192 = vmatprep.subr.msk.bf16.mxu0 %vm3068_vm7, %v1585_v3 }
 0x343   : > { %1688 = vmatpush1.bf16.msra.mxu0 %v1682_v26 }
 0x344   : > { %2197 = vmatprep.subr.msk.bf16.mxu0 %vm3069_vm13, %v1131_v47 }
 0x346   : > { %2193 = vmatmul.mubr.msk.bf16.vlgmr.msra.gmra.mrb[16].mxu0 %vm1150_vm14, %v2300_v39 }
 0x347   : > { %1767 = vmatpush1.bf16.msra.mxu0 %v1761_v12  ;;  %1729 = vmatprep.mubr.bf16.mxu0 %v2350_v0 }
 0x34e   : > { %2194 = vmatmul.mubr.msk.bf16.gmra.mrb[20].mxu0 %vm1150_vm14, %v2301_v49 }
 0x34f   : > { %1798 = vmatprep.mubr.bf16.mxu0 %v2350_v0 }
 0x356   : > { %2198 = vmatmul.mubr.msk.bf16.vlgmr.msra.gmra.mrb[16].mxu0 %vm1150_vm14, %v2302_v29 }
 0x357   : > { %1808 = vmatprep.mubr.bf16.mxu0 %v2350_v0 }
 0x35e   : > { %2199 = vmatmul.mubr.msk.bf16.gmra.mrb[20].mxu0 %vm1150_vm14, %v2303_v24 }
 0x429   : > { %v1800_v5 = vpop.f32.mrb[16].mxu0 }
 0x42a   : > { %v1851_v36 = vadd.f32 %v1834_v18, %v1800_v5  ;;  %v1802_v38 = vpop.f32.mrb[17].mxu0 }
 0x42b   : > { %v1852_v21 = vadd.f32 %v1834_v18, %v1802_v38  ;;  %v1804_v19 = vpop.f32.mrb[18].mxu0  ;;  %v1985_v38 = vpop.permute.xlu1 %1984 }
 0x42c   : > { %v1853_v11 = vadd.f32 %v1839_v20, %v1804_v19  ;;  %v1806_v34 = vpop.f32.mrb[19].mxu0  ;;  %v1859_v60 = vmax.f32 %v1851_v36, 0.0  ;;  %v1976_v36 = vld [vmem:[%s3043_s1 + $0x90] sm:$0x3] }
 0x42d   : > { %v1854_v48 = vadd.f32 %v1839_v20, %v1806_v34  ;;  %v1860_v4 = vmax.f32 %v1852_v21, 0.0 }
 0x42e   : > { %v1861_v15 = vmax.f32 %v1853_v11, 0.0 }
 0x42f   : > { %v1862_v62 = vmax.f32 %v1854_v48, 0.0 }
 0x430   : > { %v1871_v58 = vpack.c.bf16 %v1861_v15, %v1859_v60 }
 0x431   : > { %v1872_v22 = vpack.c.bf16 %v1862_v62, %v1860_v4  ;;  %v1810_v14 = vpop.f32.mrb[20].mxu0 }
 0x432   : > { %v1855_v17 = vadd.f32 %v1844_v50, %v1810_v14  ;;  %v1812_v54 = vpop.f32.mrb[21].mxu0 }
 0x433   : > { %v1856_v37 = vadd.f32 %v1844_v50, %v1812_v54  ;;  %v1814_v46 = vpop.f32.mrb[22].mxu0  ;;  %1915 = vmatprep.subr.bf16.mxu1 %v1872_v22 }
 0x434   : > { %v1857_v27 = vadd.f32 %v1849_v44, %v1814_v46  ;;  %v1816_v28 = vpop.f32.mrb[23].mxu0  ;;  %1916 = vmatpush1.bf16.msra.mxu1 %v1871_v58  ;;  %v1863_v30 = vmax.f32 %v1855_v17, 0.0 }
 0x435   : > { %v1858_v52 = vadd.f32 %v1849_v44, %v1816_v28  ;;  %v1864_v23 = vmax.f32 %v1856_v37, 0.0 }
 0x436   : > { %v1865_v56 = vmax.f32 %v1857_v27, 0.0 }
 0x437   : > { %v1866_v25 = vmax.f32 %v1858_v52, 0.0 }
 0x438   : > { %v1873_v33 = vpack.c.bf16 %v1865_v56, %v1863_v30 }
 0x439   : > { %v1874_v59 = vpack.c.bf16 %v1866_v25, %v1864_v23 }
 0x43b   : > { %1917 = vmatprep.subr.bf16.mxu1 %v1874_v59 }
 0x43c   : > { %1918 = vmatpush1.bf16.msra.mxu1 %v1873_v33 }
 0x43f   : > { %2202 = vmatmul.mubr.msk.bf16.vlgmr.msra.gmra.mrb[8].mxu1 %vm1480_vm10, %v2304_v53 }
 0x440   : > { %1957 = vmatprep.mubr.bf16.mxu1 %v2350_v0 }
 0x447   : > { %2203 = vmatmul.mubr.msk.bf16.gmra.mrb[12].mxu1 %vm1480_vm10, %v2305_v9 }
 0x448   : > { %2022 = vmatprep.mubr.bf16.mxu1 %v2350_v0 }
 0x512   : > { %v1949_v42 = vpop.f32.mrb[8].mxu1 }
 0x513   : > { %v1950_v31 = vadd.f32 %v1949_v42, %v1882_v16  ;;  %v1951_v8 = vpop.f32.mrb[9].mxu1 }
 0x514   : > { %v1952_v51 = vadd.f32 %v1951_v8, %v1882_v16  ;;  %v1953_v55 = vpop.f32.mrb[10].mxu1 }
 0x515   : > { %v1954_v7 = vadd.f32 %v1953_v55, %v1887_v32  ;;  %v1955_v63 = vpop.f32.mrb[11].mxu1  ;;  %v1968_v57 = vmax.f32 %v1950_v31, 0.0 }
 0x516   : > { %v1956_v13 = vadd.f32 %v1955_v63, %v1887_v32  ;;  %v1969_v6 = vmax.f32 %v1952_v51, 0.0 }
 0x517   : > { %v1970_v45 = vmax.f32 %v1954_v7, 0.0 }
 0x518   : > { %v1971_v41 = vmax.f32 %v1956_v13, 0.0 }
 0x519   : > { %v1977_v40 = vpack.c.bf16 %v1970_v45, %v1968_v57 }
 0x51a   : > { %v1978_v61 = vpack.c.bf16 %v1971_v41, %v1969_v6  ;;  %v1959_v1 = vpop.f32.mrb[12].mxu1 }
 0x51b   : > { %v1960_v43 = vadd.f32 %v1959_v1, %v1892_v35  ;;  %v1961_v0 = vpop.f32.mrb[13].mxu1 }
 0x51c   : > { %v1962_v3 = vadd.f32 %v1961_v0, %v1892_v35  ;;  %v1963_v26 = vpop.f32.mrb[14].mxu1  ;;  %1990 = vmatprep.subr.bf16.mxu1 %v1978_v61 }
 0x51d   : > { %v1964_v47 = vadd.f32 %v1963_v26, %v1897_v10  ;;  %v1965_v39 = vpop.f32.mrb[15].mxu1  ;;  %1991 = vmatpush1.bf16.msra.mxu1 %v1977_v40  ;;  %v1972_v12 = vmax.f32 %v1960_v43, 0.0 }
 0x51e   : > { %v1966_v2 = vadd.f32 %v1965_v39, %v1897_v10  ;;  %v1973_v29 = vmax.f32 %v1962_v3, 0.0 }
 0x51f   : > { %v1974_v49 = vmax.f32 %v1964_v47, 0.0 }
 0x520   : > { %v1975_v24 = vmax.f32 %v1966_v2, 0.0 }
 0x521   : > { %v1979_v18 = vpack.c.bf16 %v1974_v49, %v1972_v12 }
 0x522   : > { %v1980_v5 = vpack.c.bf16 %v1975_v24, %v1973_v29 }
 0x524   : > { %1992 = vmatprep.subr.bf16.mxu1 %v1980_v5 }
 0x525   : > { %1993 = vmatpush1.bf16.msra.mxu1 %v1979_v18 }
 0x528   : > { %2204 = vmatmul.mubr.msk.bf16.vlgmr.msra.gmra.mrb[16].mxu1 %vm1480_vm10, %v1976_v36 }
 0x5fb   : > { %v2024_v20 = vpop.f32.mrb[16].mxu1 }
 0x5fc   : > { %v2025_v21 = vadd.f32 %v2024_v20, %v1985_v38  ;;  %v2026_v19 = vpop.f32.mrb[17].mxu1 }
 0x5fd   : > { %v2027_v11 = vadd.f32 %v2026_v19, %v1985_v38  ;;  %v2028_v34 = vpop.f32.mrb[18].mxu1 }
 0x5fe   : > { %2033 = vst [vmem:[%s2986_s30 + $0x10] sm:$0x7] %v2025_v21  ;;  %v2029_v48 = vpop.f32.mrb[19].mxu1 }
 0x5ff   : > { %2034 = vst [vmem:[%s2986_s30 + $0x18] sm:$0x7] %v2027_v11 }
 0x600 PF: > { %s13_s14 = sadd.s32 1, %s2348_s14   ;;  %s3071_s12 = smov %s2344_s13 }
 0x601   : > { %p10_p5 = scmp.ge.s32.totalorder %s13_s14, 4   ;;  %s3072_s13 = smov %s3074_s15 }
 0x603   :  { %12 = sbr.rel (!%p10_p5) target bundleno = 2 (0x2), region = 62 }

</bundles_post_ra>
